<compile_context>
chip_gen: v7x
topology: tpu7x:2x2x1
jax: 0.10.0
libtpu: 0.0.40
codegen_flags: <defaults>
</compile_context>

<pallas_src>
import jax
import jax.numpy as jnp
from jax.experimental import pallas as pl
from jax.experimental.pallas import tpu as pltpu


# --------------------------- Pallas kernel ---------------------------------

def _agcrn_layer_kernel(x_ref, h0_ref, sup_ref, e_ref, wx_ref, wgh_ref,
                        wuh_ref, b_ref, out_ref, state_ref):
    """One grid step = one (batch b, timestep t) AGCRN GRU-cell update."""
    t = pl.program_id(1)

    @pl.when(t == 0)
    def _():
        # New batch row: reload the initial hidden state into the carried scratch.
        state_ref[...] = h0_ref[0]

    hdim = state_ref.shape[-1]        # H
    km1 = sup_ref.shape[0]            # number of non-identity Chebyshev supports
    d = e_ref.shape[-1]               # embedding dim D

    x = x_ref[0, 0]                   # (N, Cin)
    h = state_ref[...]                # (N, H)
    e = e_ref[...]                    # (N, D)
    b = b_ref[...]                    # (N, 3H)  [gate bias (2H) | update bias (H)]

    def propagate(v):
        # Chebyshev graph propagation.  supports[0] == I, so its matmul is
        # skipped and v itself is the k=0 block.  Result: (N, K*C), n-leading.
        parts = [v] + [
            jnp.dot(sup_ref[k], v, preferred_element_type=jnp.float32)
            for k in range(km1)
        ]
        return jnp.concatenate(parts, axis=-1)

    def embed_contract(y, o):
        # y: (N, D*o) pool-space pre-activations (column index = d*o + o').
        # Per-node adaptive mix with the node embeddings:
        #   out[n, o'] = sum_d E[n, d] * y[n, d*o + o']
        acc = e[:, 0:1] * y[:, :o]
        for di in range(1, d):
            acc = acc + e[:, di:di + 1] * y[:, di * o:(di + 1) * o]
        return acc

    # ---- gate (z, r) plus the x-side of the candidate, all on the MXU -------
    xg_x = propagate(x)                                                   # (N, K*Cin)
    xg_h = propagate(h)                                                   # (N, K*H)
    yx = jnp.dot(xg_x, wx_ref[...], preferred_element_type=jnp.float32)   # (N, D*3H)
    ygh = jnp.dot(xg_h, wgh_ref[...], preferred_element_type=jnp.float32)  # (N, D*2H)
    px = embed_contract(yx, 3 * hdim)      # (N, 3H): [gate-x (2H) | update-x (H)]
    pgh = embed_contract(ygh, 2 * hdim)    # (N, 2H)

    zr = jax.nn.sigmoid(px[:, :2 * hdim] + pgh + b[:, :2 * hdim])
    z = zr[:, :hdim]
    r = zr[:, hdim:]

    # ---- candidate uses z * h on the h-side ---------------------------------
    zh = z * h
    xg_zh = propagate(zh)                                                 # (N, K*H)
    yuh = jnp.dot(xg_zh, wuh_ref[...], preferred_element_type=jnp.float32)  # (N, D*H)
    puh = embed_contract(yuh, hdim)                                       # (N, H)

    hc = jnp.tanh(px[:, 2 * hdim:] + puh + b[:, 2 * hdim:])
    h_new = r * h + (1.0 - r) * hc          # AGCRN's (nonstandard) GRU mixing

    state_ref[...] = h_new
    out_ref[0, 0] = h_new


def agcrn_layer_pallas(x_seq, init_state, sup_rest, node_emb, wx, wgh, wuh,
                       b_all):
    """Run one AGCRN recurrent layer over the whole sequence in one pallas_call."""
    B, T, N, Cin = x_seq.shape
    H = init_state.shape[-1]
    Km1 = sup_rest.shape[0]
    return pl.pallas_call(
        _agcrn_layer_kernel,
        out_shape=jax.ShapeDtypeStruct((B, T, N, H), jnp.float32),
        grid=(B, T),
        in_specs=[
            pl.BlockSpec((1, 1, N, Cin), lambda b, t: (b, t, 0, 0)),   # x_t
            pl.BlockSpec((1, N, H), lambda b, t: (b, 0, 0)),           # init_state
            pl.BlockSpec((Km1, N, N), lambda b, t: (0, 0, 0)),         # supports[1:]
            pl.BlockSpec(node_emb.shape, lambda b, t: (0, 0)),         # E (N, D)
            pl.BlockSpec(wx.shape, lambda b, t: (0, 0)),               # x-side pool W
            pl.BlockSpec(wgh.shape, lambda b, t: (0, 0)),              # gate h-side W
            pl.BlockSpec(wuh.shape, lambda b, t: (0, 0)),              # update h-side W
            pl.BlockSpec(b_all.shape, lambda b, t: (0, 0)),            # biases (N, 3H)
        ],
        out_specs=pl.BlockSpec((1, 1, N, H), lambda b, t: (b, t, 0, 0)),
        scratch_shapes=[pltpu.VMEM((N, H), jnp.float32)],              # carried state
        compiler_params=pltpu.CompilerParams(
            dimension_semantics=("parallel", "arbitrary"),
            vmem_limit_bytes=32 * 1024 * 1024),
    )(x_seq, init_state, sup_rest, node_emb, wx, wgh, wuh, b_all)


# --------------------------- JAX glue ---------------------------------------

def compute_supports(E, cheb_k):
    N = E.shape[0]
    A = jax.nn.softmax(jax.nn.relu(E @ E.T), axis=1)
    S = [jnp.eye(N, dtype=E.dtype), A]
    for _ in range(2, cheb_k):
        S.append(2.0 * A @ S[-1] - S[-2])
    return jnp.stack(S, axis=0)          # (K, N, N)


def prepare_layer_params(E, p, din, H):
    """Split weight pools into x/h parts and flatten them into 2-D MXU operands.

    Row index of the flattened pools is (k*C + i) — matching the kernel's
    lane-concatenated propagation order [I, S1, S2, ...] — and the column index
    is (d*O + o), consumed by the kernel's per-node embedding contraction.
    The gate/update x-parts are fused along the output axis (O = 3H).
    """
    gw, uw = p['gate_w'], p['upd_w']       # (D, K, din+H, 2H), (D, K, din+H, H)
    K = gw.shape[1]
    wx = jnp.concatenate([gw[:, :, :din, :], uw[:, :, :din, :]], axis=-1)     # (D,K,din,3H)
    wx = jnp.transpose(wx, (1, 2, 0, 3)).reshape(K * din, -1)                 # (K*din, D*3H)
    wgh = jnp.transpose(gw[:, :, din:, :], (1, 2, 0, 3)).reshape(K * H, -1)   # (K*H, D*2H)
    wuh = jnp.transpose(uw[:, :, din:, :], (1, 2, 0, 3)).reshape(K * H, -1)   # (K*H, D*H)
    b_all = jnp.concatenate([E @ p['gate_b'], E @ p['upd_b']], axis=-1)       # (N, 3H)
    return wx, wgh, wuh, b_all


def avwdcrnn_forward(x, init_state, node_embeddings, params, cheb_k):
    # x: (B, T, N, Din); init_state: (L, B, N, H); node_embeddings: (N, D)
    assert cheb_k >= 2, "this implementation assumes at least one non-identity support"
    sup_rest = compute_supports(node_embeddings, cheb_k)[1:]   # drop identity
    H = init_state.shape[-1]
    current = x
    output_hidden = []
    for i, p in enumerate(params):
        din = current.shape[-1]
        wx, wgh, wuh, b_all = prepare_layer_params(node_embeddings, p, din, H)
        current = agcrn_layer_pallas(current, init_state[i], sup_rest,
                                     node_embeddings, wx, wgh, wuh, b_all)
        output_hidden.append(current[:, -1])   # final state == last timestep output
    return current, output_hidden


# --------------------------- pure-JAX reference ------------------------------

def _avwgcn_ref(x, E, wpool, bpool, cheb_k):
    N = E.shape[0]
    A = jax.nn.softmax(jax.nn.relu(E @ E.T), axis=1)
    S = [jnp.eye(N, dtype=x.dtype), A]
    for _ in range(2, cheb_k):
        S.append(2.0 * A @ S[-1] - S[-2])
    supports = jnp.stack(S, 0)
    weights = jnp.einsum('nd,dkio->nkio', E, wpool)
    bias = E @ bpool
    x_g = jnp.einsum('knm,bmc->bknc', supports, x)
    x_g = jnp.transpose(x_g, (0, 2, 1, 3))
    return jnp.einsum('bnki,nkio->bno', x_g, weights) + bias


def _cell_ref(x, state, E, p, cheb_k, H):
    cat = jnp.concatenate([x, state], axis=-1)
    zr = jax.nn.sigmoid(_avwgcn_ref(cat, E, p['gate_w'], p['gate_b'], cheb_k))
    z, r = zr[..., :H], zr[..., H:]
    cand = jnp.concatenate([x, z * state], axis=-1)
    hc = jnp.tanh(_avwgcn_ref(cand, E, p['upd_w'], p['upd_b'], cheb_k))
    return r * state + (1.0 - r) * hc


def avwdcrnn_ref(x, init_state, E, params, cheb_k, H):
    T = x.shape[1]
    current = x
    hiddens = []
    for i, p in enumerate(params):
        state = init_state[i]
        inner = []
        for t in range(T):
            state = _cell_ref(current[:, t], state, E, p, cheb_k, H)
            inner.append(state)
        hiddens.append(state)
        current = jnp.stack(inner, axis=1)
    return current, hiddens


# --------------------------- main --------------------------------------------

if __name__ == "__main__":
    B, T, N, Din, H, K, D, L = 2, 4, 16, 4, 32, 3, 8, 2

    key = jax.random.PRNGKey(0)
    keys = jax.random.split(key, 3 + 4 * L)
    x = jax.random.normal(keys[0], (B, T, N, Din), jnp.float32)
    node_embeddings = jax.random.normal(keys[1], (N, D), jnp.float32)
    init_state = jnp.zeros((L, B, N, H), jnp.float32)

    params = []
    for i in range(L):
        cin = Din if i == 0 else H
        k0, k1, k2, k3 = keys[3 + 4 * i: 3 + 4 * i + 4]
        params.append(dict(
            gate_w=0.1 * jax.random.normal(k0, (D, K, cin + H, 2 * H), jnp.float32),
            gate_b=0.1 * jax.random.normal(k1, (D, 2 * H), jnp.float32),
            upd_w=0.1 * jax.random.normal(k2, (D, K, cin + H, H), jnp.float32),
            upd_b=0.1 * jax.random.normal(k3, (D, H), jnp.float32),
        ))

    out, hidden = avwdcrnn_forward(x, init_state, node_embeddings, params, K)
    out = jax.block_until_ready(out)
    hidden = jax.block_until_ready(jnp.stack(hidden, axis=0))

    # Numerical check against a pure-JAX reference of the PyTorch semantics.
    # Tolerance covers MXU matmul reassociation / reduced-precision differences
    # between the pool-factorized kernel and the per-node-weight reference.
    out_ref, hid_ref = avwdcrnn_ref(x, init_state, node_embeddings, params, K, H)
    hid_ref = jnp.stack(hid_ref, axis=0)
    assert out.shape == (B, T, N, H) and hidden.shape == (L, B, N, H)
    assert jnp.allclose(out, out_ref, atol=1e-2, rtol=1e-2), \
        float(jnp.max(jnp.abs(out - out_ref)))
    assert jnp.allclose(hidden, hid_ref, atol=1e-2, rtol=1e-2), \
        float(jnp.max(jnp.abs(hidden - hid_ref)))

    print("KERNEL_OK")
</pallas_src>

<mosaic_0001>
module attributes {stable_mosaic.version = 11 : i64} {
  func.func @_agcrn_layer_kernel(%arg0: i32, %arg1: i32, %arg2: memref<1x1x16x4xf32, #tpu.memory_space<vmem>>, %arg3: memref<1x16x32xf32, #tpu.memory_space<vmem>>, %arg4: memref<2x16x16xf32, #tpu.memory_space<vmem>>, %arg5: memref<16x8xf32, #tpu.memory_space<vmem>>, %arg6: memref<12x768xf32, #tpu.memory_space<vmem>>, %arg7: memref<96x512xf32, #tpu.memory_space<vmem>>, %arg8: memref<96x256xf32, #tpu.memory_space<vmem>>, %arg9: memref<16x96xf32, #tpu.memory_space<vmem>>, %arg10: memref<1x1x16x32xf32, #tpu.memory_space<vmem>>, %arg11: memref<16x32xf32, #tpu.memory_space<vmem>>) attributes {dimension_semantics = [#tpu.dimension_semantics<parallel>, #tpu.dimension_semantics<arbitrary>], iteration_bounds = array<i64: 2, 4>, scalar_prefetch = 0 : i64, scratch_operands = 1 : i64, tpu.core_type = #tpu.core_type<tc>, window_params = [{transform_indices = @transform_0, window_bounds = array<i64: 1, 1, 16, 4>}, {transform_indices = @transform_1, window_bounds = array<i64: 1, 16, 32>}, {pipeline_mode = #tpu.pipeline_mode<synchronous>, transform_indices = @transform_2, window_bounds = array<i64: 2, 16, 16>}, {pipeline_mode = #tpu.pipeline_mode<synchronous>, transform_indices = @transform_3, window_bounds = array<i64: 16, 8>}, {pipeline_mode = #tpu.pipeline_mode<synchronous>, transform_indices = @transform_4, window_bounds = array<i64: 12, 768>}, {pipeline_mode = #tpu.pipeline_mode<synchronous>, transform_indices = @transform_5, window_bounds = array<i64: 96, 512>}, {pipeline_mode = #tpu.pipeline_mode<synchronous>, transform_indices = @transform_6, window_bounds = array<i64: 96, 256>}, {pipeline_mode = #tpu.pipeline_mode<synchronous>, transform_indices = @transform_7, window_bounds = array<i64: 16, 96>}, {transform_indices = @transform_8, window_bounds = array<i64: 1, 1, 16, 32>}]} {
    %c0_i32 = arith.constant 0 : i32
    %0 = arith.cmpi eq, %arg1, %c0_i32 : i32
    %1 = arith.extui %0 : i1 to i32
    %c0_i32_0 = arith.constant 0 : i32
    %2 = arith.cmpi ne, %1, %c0_i32_0 : i32
    scf.if %2 {
      %c0_49 = arith.constant 0 : index
      %c0_50 = arith.constant 0 : index
      %c0_51 = arith.constant 0 : index
      %178 = vector.load %arg3[%c0_49, %c0_50, %c0_51] : memref<1x16x32xf32, #tpu.memory_space<vmem>>, vector<1x16x32xf32>
      %179 = vector.shape_cast %178 : vector<1x16x32xf32> to vector<16x32xf32>
      %c0_52 = arith.constant 0 : index
      %c0_53 = arith.constant 0 : index
      %180 = vector.load %arg11[%c0_52, %c0_53] : memref<16x32xf32, #tpu.memory_space<vmem>>, vector<16x32xf32>
      tpu.vector_store %arg11[%c0_52, %c0_53], %179 {strides = array<i32>} : memref<16x32xf32, #tpu.memory_space<vmem>>, vector<16x32xf32>,
    } else {
    }
    %c0 = arith.constant 0 : index
    %c0_1 = arith.constant 0 : index
    %c0_2 = arith.constant 0 : index
    %c0_3 = arith.constant 0 : index
    %3 = vector.load %arg2[%c0, %c0_1, %c0_2, %c0_3] : memref<1x1x16x4xf32, #tpu.memory_space<vmem>>, vector<1x1x16x4xf32>
    %4 = vector.shape_cast %3 : vector<1x1x16x4xf32> to vector<16x4xf32>
    %c0_4 = arith.constant 0 : index
    %c0_5 = arith.constant 0 : index
    %5 = vector.load %arg11[%c0_4, %c0_5] : memref<16x32xf32, #tpu.memory_space<vmem>>, vector<16x32xf32>
    %c0_6 = arith.constant 0 : index
    %c0_7 = arith.constant 0 : index
    %6 = vector.load %arg5[%c0_6, %c0_7] : memref<16x8xf32, #tpu.memory_space<vmem>>, vector<16x8xf32>
    %c0_8 = arith.constant 0 : index
    %c0_9 = arith.constant 0 : index
    %7 = vector.load %arg9[%c0_8, %c0_9] : memref<16x96xf32, #tpu.memory_space<vmem>>, vector<16x96xf32>
    %c0_10 = arith.constant 0 : index
    %c0_11 = arith.constant 0 : index
    %c0_12 = arith.constant 0 : index
    %8 = vector.load %arg4[%c0_10, %c0_11, %c0_12] : memref<2x16x16xf32, #tpu.memory_space<vmem>>, vector<1x16x16xf32>
    %9 = vector.shape_cast %8 : vector<1x16x16xf32> to vector<16x16xf32>
    %cst = arith.constant dense<0.000000e+00> : vector<16x4xf32>
    %10 = tpu.matmul %9, %4, %cst {dimension_numbers = #tpu.dot_dimension_numbers<[1], [0], [0], [1], [0, 0, 1, 1], [], []>} : vector<16x16xf32>, vector<16x4xf32>, vector<16x4xf32> -> vector<16x4xf32>
    %c1 = arith.constant 1 : index
    %c0_13 = arith.constant 0 : index
    %c0_14 = arith.constant 0 : index
    %11 = vector.load %arg4[%c1, %c0_13, %c0_14] : memref<2x16x16xf32, #tpu.memory_space<vmem>>, vector<1x16x16xf32>
    %12 = vector.shape_cast %11 : vector<1x16x16xf32> to vector<16x16xf32>
    %cst_15 = arith.constant dense<0.000000e+00> : vector<16x4xf32>
    %13 = tpu.matmul %12, %4, %cst_15 {dimension_numbers = #tpu.dot_dimension_numbers<[1], [0], [0], [1], [0, 0, 1, 1], [], []>} : vector<16x16xf32>, vector<16x4xf32>, vector<16x4xf32> -> vector<16x4xf32>
    %14 = tpu.concatenate %4, %10, %13 in 1 : vector<16x4xf32>, vector<16x4xf32>, vector<16x4xf32> -> vector<16x12xf32>
    %c0_16 = arith.constant 0 : index
    %c0_17 = arith.constant 0 : index
    %c0_18 = arith.constant 0 : index
    %15 = vector.load %arg4[%c0_16, %c0_17, %c0_18] : memref<2x16x16xf32, #tpu.memory_space<vmem>>, vector<1x16x16xf32>
    %16 = vector.shape_cast %15 : vector<1x16x16xf32> to vector<16x16xf32>
    %cst_19 = arith.constant dense<0.000000e+00> : vector<16x32xf32>
    %17 = tpu.matmul %16, %5, %cst_19 {dimension_numbers = #tpu.dot_dimension_numbers<[1], [0], [0], [1], [0, 0, 1, 1], [], []>} : vector<16x16xf32>, vector<16x32xf32>, vector<16x32xf32> -> vector<16x32xf32>
    %c1_20 = arith.constant 1 : index
    %c0_21 = arith.constant 0 : index
    %c0_22 = arith.constant 0 : index
    %18 = vector.load %arg4[%c1_20, %c0_21, %c0_22] : memref<2x16x16xf32, #tpu.memory_space<vmem>>, vector<1x16x16xf32>
    %19 = vector.shape_cast %18 : vector<1x16x16xf32> to vector<16x16xf32>
    %cst_23 = arith.constant dense<0.000000e+00> : vector<16x32xf32>
    %20 = tpu.matmul %19, %5, %cst_23 {dimension_numbers = #tpu.dot_dimension_numbers<[1], [0], [0], [1], [0, 0, 1, 1], [], []>} : vector<16x16xf32>, vector<16x32xf32>, vector<16x32xf32> -> vector<16x32xf32>
    %21 = tpu.concatenate %5, %17, %20 in 1 : vector<16x32xf32>, vector<16x32xf32>, vector<16x32xf32> -> vector<16x96xf32>
    %c0_24 = arith.constant 0 : index
    %c0_25 = arith.constant 0 : index
    %22 = vector.load %arg6[%c0_24, %c0_25] : memref<12x768xf32, #tpu.memory_space<vmem>>, vector<12x768xf32>
    %cst_26 = arith.constant dense<0.000000e+00> : vector<16x768xf32>
    %23 = tpu.matmul %14, %22, %cst_26 {dimension_numbers = #tpu.dot_dimension_numbers<[1], [0], [0], [1], [0, 0, 1, 1], [], []>} : vector<16x12xf32>, vector<12x768xf32>, vector<16x768xf32> -> vector<16x768xf32>
    %c0_27 = arith.constant 0 : index
    %c0_28 = arith.constant 0 : index
    %24 = vector.load %arg7[%c0_27, %c0_28] : memref<96x512xf32, #tpu.memory_space<vmem>>, vector<96x512xf32>
    %cst_29 = arith.constant dense<0.000000e+00> : vector<16x512xf32>
    %25 = tpu.matmul %21, %24, %cst_29 {dimension_numbers = #tpu.dot_dimension_numbers<[1], [0], [0], [1], [0, 0, 1, 1], [], []>} : vector<16x96xf32>, vector<96x512xf32>, vector<16x512xf32> -> vector<16x512xf32>
    %26 = vector.extract_strided_slice %6 {offsets = [0, 0], sizes = [16, 1], strides = [1, 1]} : vector<16x8xf32> to vector<16x1xf32>
    %27 = vector.extract_strided_slice %23 {offsets = [0, 0], sizes = [16, 96], strides = [1, 1]} : vector<16x768xf32> to vector<16x96xf32>
    %28 = vector.broadcast %26 : vector<16x1xf32> to vector<16x96xf32>
    %29 = arith.mulf %28, %27 : vector<16x96xf32>
    %30 = vector.extract_strided_slice %6 {offsets = [0, 1], sizes = [16, 1], strides = [1, 1]} : vector<16x8xf32> to vector<16x1xf32>
    %31 = vector.extract_strided_slice %23 {offsets = [0, 96], sizes = [16, 96], strides = [1, 1]} : vector<16x768xf32> to vector<16x96xf32>
    %32 = vector.broadcast %30 : vector<16x1xf32> to vector<16x96xf32>
    %33 = arith.mulf %32, %31 : vector<16x96xf32>
    %34 = arith.addf %29, %33 : vector<16x96xf32>
    %35 = vector.extract_strided_slice %6 {offsets = [0, 2], sizes = [16, 1], strides = [1, 1]} : vector<16x8xf32> to vector<16x1xf32>
    %36 = vector.extract_strided_slice %23 {offsets = [0, 192], sizes = [16, 96], strides = [1, 1]} : vector<16x768xf32> to vector<16x96xf32>
    %37 = vector.broadcast %35 : vector<16x1xf32> to vector<16x96xf32>
    %38 = arith.mulf %37, %36 : vector<16x96xf32>
    %39 = arith.addf %34, %38 : vector<16x96xf32>
    %40 = vector.extract_strided_slice %6 {offsets = [0, 3], sizes = [16, 1], strides = [1, 1]} : vector<16x8xf32> to vector<16x1xf32>
    %41 = vector.extract_strided_slice %23 {offsets = [0, 288], sizes = [16, 96], strides = [1, 1]} : vector<16x768xf32> to vector<16x96xf32>
    %42 = vector.broadcast %40 : vector<16x1xf32> to vector<16x96xf32>
    %43 = arith.mulf %42, %41 : vector<16x96xf32>
    %44 = arith.addf %39, %43 : vector<16x96xf32>
    %45 = vector.extract_strided_slice %6 {offsets = [0, 4], sizes = [16, 1], strides = [1, 1]} : vector<16x8xf32> to vector<16x1xf32>
    %46 = vector.extract_strided_slice %23 {offsets = [0, 384], sizes = [16, 96], strides = [1, 1]} : vector<16x768xf32> to vector<16x96xf32>
    %47 = vector.broadcast %45 : vector<16x1xf32> to vector<16x96xf32>
    %48 = arith.mulf %47, %46 : vector<16x96xf32>
    %49 = arith.addf %44, %48 : vector<16x96xf32>
    %50 = vector.extract_strided_slice %6 {offsets = [0, 5], sizes = [16, 1], strides = [1, 1]} : vector<16x8xf32> to vector<16x1xf32>
    %51 = vector.extract_strided_slice %23 {offsets = [0, 480], sizes = [16, 96], strides = [1, 1]} : vector<16x768xf32> to vector<16x96xf32>
    %52 = vector.broadcast %50 : vector<16x1xf32> to vector<16x96xf32>
    %53 = arith.mulf %52, %51 : vector<16x96xf32>
    %54 = arith.addf %49, %53 : vector<16x96xf32>
    %55 = vector.extract_strided_slice %6 {offsets = [0, 6], sizes = [16, 1], strides = [1, 1]} : vector<16x8xf32> to vector<16x1xf32>
    %56 = vector.extract_strided_slice %23 {offsets = [0, 576], sizes = [16, 96], strides = [1, 1]} : vector<16x768xf32> to vector<16x96xf32>
    %57 = vector.broadcast %55 : vector<16x1xf32> to vector<16x96xf32>
    %58 = arith.mulf %57, %56 : vector<16x96xf32>
    %59 = arith.addf %54, %58 : vector<16x96xf32>
    %60 = vector.extract_strided_slice %6 {offsets = [0, 7], sizes = [16, 1], strides = [1, 1]} : vector<16x8xf32> to vector<16x1xf32>
    %61 = vector.extract_strided_slice %23 {offsets = [0, 672], sizes = [16, 96], strides = [1, 1]} : vector<16x768xf32> to vector<16x96xf32>
    %62 = vector.broadcast %60 : vector<16x1xf32> to vector<16x96xf32>
    %63 = arith.mulf %62, %61 : vector<16x96xf32>
    %64 = arith.addf %59, %63 : vector<16x96xf32>
    %65 = vector.extract_strided_slice %6 {offsets = [0, 0], sizes = [16, 1], strides = [1, 1]} : vector<16x8xf32> to vector<16x1xf32>
    %66 = vector.extract_strided_slice %25 {offsets = [0, 0], sizes = [16, 64], strides = [1, 1]} : vector<16x512xf32> to vector<16x64xf32>
    %67 = vector.broadcast %65 : vector<16x1xf32> to vector<16x64xf32>
    %68 = arith.mulf %67, %66 : vector<16x64xf32>
    %69 = vector.extract_strided_slice %6 {offsets = [0, 1], sizes = [16, 1], strides = [1, 1]} : vector<16x8xf32> to vector<16x1xf32>
    %70 = vector.extract_strided_slice %25 {offsets = [0, 64], sizes = [16, 64], strides = [1, 1]} : vector<16x512xf32> to vector<16x64xf32>
    %71 = vector.broadcast %69 : vector<16x1xf32> to vector<16x64xf32>
    %72 = arith.mulf %71, %70 : vector<16x64xf32>
    %73 = arith.addf %68, %72 : vector<16x64xf32>
    %74 = vector.extract_strided_slice %6 {offsets = [0, 2], sizes = [16, 1], strides = [1, 1]} : vector<16x8xf32> to vector<16x1xf32>
    %75 = vector.extract_strided_slice %25 {offsets = [0, 128], sizes = [16, 64], strides = [1, 1]} : vector<16x512xf32> to vector<16x64xf32>
    %76 = vector.broadcast %74 : vector<16x1xf32> to vector<16x64xf32>
    %77 = arith.mulf %76, %75 : vector<16x64xf32>
    %78 = arith.addf %73, %77 : vector<16x64xf32>
    %79 = vector.extract_strided_slice %6 {offsets = [0, 3], sizes = [16, 1], strides = [1, 1]} : vector<16x8xf32> to vector<16x1xf32>
    %80 = vector.extract_strided_slice %25 {offsets = [0, 192], sizes = [16, 64], strides = [1, 1]} : vector<16x512xf32> to vector<16x64xf32>
    %81 = vector.broadcast %79 : vector<16x1xf32> to vector<16x64xf32>
    %82 = arith.mulf %81, %80 : vector<16x64xf32>
    %83 = arith.addf %78, %82 : vector<16x64xf32>
    %84 = vector.extract_strided_slice %6 {offsets = [0, 4], sizes = [16, 1], strides = [1, 1]} : vector<16x8xf32> to vector<16x1xf32>
    %85 = vector.extract_strided_slice %25 {offsets = [0, 256], sizes = [16, 64], strides = [1, 1]} : vector<16x512xf32> to vector<16x64xf32>
    %86 = vector.broadcast %84 : vector<16x1xf32> to vector<16x64xf32>
    %87 = arith.mulf %86, %85 : vector<16x64xf32>
    %88 = arith.addf %83, %87 : vector<16x64xf32>
    %89 = vector.extract_strided_slice %6 {offsets = [0, 5], sizes = [16, 1], strides = [1, 1]} : vector<16x8xf32> to vector<16x1xf32>
    %90 = vector.extract_strided_slice %25 {offsets = [0, 320], sizes = [16, 64], strides = [1, 1]} : vector<16x512xf32> to vector<16x64xf32>
    %91 = vector.broadcast %89 : vector<16x1xf32> to vector<16x64xf32>
    %92 = arith.mulf %91, %90 : vector<16x64xf32>
    %93 = arith.addf %88, %92 : vector<16x64xf32>
    %94 = vector.extract_strided_slice %6 {offsets = [0, 6], sizes = [16, 1], strides = [1, 1]} : vector<16x8xf32> to vector<16x1xf32>
    %95 = vector.extract_strided_slice %25 {offsets = [0, 384], sizes = [16, 64], strides = [1, 1]} : vector<16x512xf32> to vector<16x64xf32>
    %96 = vector.broadcast %94 : vector<16x1xf32> to vector<16x64xf32>
    %97 = arith.mulf %96, %95 : vector<16x64xf32>
    %98 = arith.addf %93, %97 : vector<16x64xf32>
    %99 = vector.extract_strided_slice %6 {offsets = [0, 7], sizes = [16, 1], strides = [1, 1]} : vector<16x8xf32> to vector<16x1xf32>
    %100 = vector.extract_strided_slice %25 {offsets = [0, 448], sizes = [16, 64], strides = [1, 1]} : vector<16x512xf32> to vector<16x64xf32>
    %101 = vector.broadcast %99 : vector<16x1xf32> to vector<16x64xf32>
    %102 = arith.mulf %101, %100 : vector<16x64xf32>
    %103 = arith.addf %98, %102 : vector<16x64xf32>
    %104 = vector.extract_strided_slice %64 {offsets = [0, 0], sizes = [16, 64], strides = [1, 1]} : vector<16x96xf32> to vector<16x64xf32>
    %105 = arith.addf %104, %103 : vector<16x64xf32>
    %106 = vector.extract_strided_slice %7 {offsets = [0, 0], sizes = [16, 64], strides = [1, 1]} : vector<16x96xf32> to vector<16x64xf32>
    %107 = arith.addf %105, %106 : vector<16x64xf32>
    %108 = arith.negf %107 : vector<16x64xf32>
    %109 = math.exp %108 : vector<16x64xf32>
    %cst_30 = arith.constant 1.000000e+00 : f32
    %110 = vector.broadcast %cst_30 : f32 to vector<16x64xf32>
    %111 = arith.addf %110, %109 : vector<16x64xf32>
    %112 = arith.divf %110, %111 : vector<16x64xf32>
    %113 = vector.extract_strided_slice %112 {offsets = [0, 0], sizes = [16, 32], strides = [1, 1]} : vector<16x64xf32> to vector<16x32xf32>
    %114 = vector.extract_strided_slice %112 {offsets = [0, 32], sizes = [16, 32], strides = [1, 1]} : vector<16x64xf32> to vector<16x32xf32>
    %115 = arith.mulf %113, %5 : vector<16x32xf32>
    %c0_31 = arith.constant 0 : index
    %c0_32 = arith.constant 0 : index
    %c0_33 = arith.constant 0 : index
    %116 = vector.load %arg4[%c0_31, %c0_32, %c0_33] : memref<2x16x16xf32, #tpu.memory_space<vmem>>, vector<1x16x16xf32>
    %117 = vector.shape_cast %116 : vector<1x16x16xf32> to vector<16x16xf32>
    %cst_34 = arith.constant dense<0.000000e+00> : vector<16x32xf32>
    %118 = tpu.matmul %117, %115, %cst_34 {dimension_numbers = #tpu.dot_dimension_numbers<[1], [0], [0], [1], [0, 0, 1, 1], [], []>} : vector<16x16xf32>, vector<16x32xf32>, vector<16x32xf32> -> vector<16x32xf32>
    %c1_35 = arith.constant 1 : index
    %c0_36 = arith.constant 0 : index
    %c0_37 = arith.constant 0 : index
    %119 = vector.load %arg4[%c1_35, %c0_36, %c0_37] : memref<2x16x16xf32, #tpu.memory_space<vmem>>, vector<1x16x16xf32>
    %120 = vector.shape_cast %119 : vector<1x16x16xf32> to vector<16x16xf32>
    %cst_38 = arith.constant dense<0.000000e+00> : vector<16x32xf32>
    %121 = tpu.matmul %120, %115, %cst_38 {dimension_numbers = #tpu.dot_dimension_numbers<[1], [0], [0], [1], [0, 0, 1, 1], [], []>} : vector<16x16xf32>, vector<16x32xf32>, vector<16x32xf32> -> vector<16x32xf32>
    %122 = tpu.concatenate %115, %118, %121 in 1 : vector<16x32xf32>, vector<16x32xf32>, vector<16x32xf32> -> vector<16x96xf32>
    %c0_39 = arith.constant 0 : index
    %c0_40 = arith.constant 0 : index
    %123 = vector.load %arg8[%c0_39, %c0_40] : memref<96x256xf32, #tpu.memory_space<vmem>>, vector<96x256xf32>
    %cst_41 = arith.constant dense<0.000000e+00> : vector<16x256xf32>
    %124 = tpu.matmul %122, %123, %cst_41 {dimension_numbers = #tpu.dot_dimension_numbers<[1], [0], [0], [1], [0, 0, 1, 1], [], []>} : vector<16x96xf32>, vector<96x256xf32>, vector<16x256xf32> -> vector<16x256xf32>
    %125 = vector.extract_strided_slice %6 {offsets = [0, 0], sizes = [16, 1], strides = [1, 1]} : vector<16x8xf32> to vector<16x1xf32>
    %126 = vector.extract_strided_slice %124 {offsets = [0, 0], sizes = [16, 32], strides = [1, 1]} : vector<16x256xf32> to vector<16x32xf32>
    %127 = vector.broadcast %125 : vector<16x1xf32> to vector<16x32xf32>
    %128 = arith.mulf %127, %126 : vector<16x32xf32>
    %129 = vector.extract_strided_slice %6 {offsets = [0, 1], sizes = [16, 1], strides = [1, 1]} : vector<16x8xf32> to vector<16x1xf32>
    %130 = vector.extract_strided_slice %124 {offsets = [0, 32], sizes = [16, 32], strides = [1, 1]} : vector<16x256xf32> to vector<16x32xf32>
    %131 = vector.broadcast %129 : vector<16x1xf32> to vector<16x32xf32>
    %132 = arith.mulf %131, %130 : vector<16x32xf32>
    %133 = arith.addf %128, %132 : vector<16x32xf32>
    %134 = vector.extract_strided_slice %6 {offsets = [0, 2], sizes = [16, 1], strides = [1, 1]} : vector<16x8xf32> to vector<16x1xf32>
    %135 = vector.extract_strided_slice %124 {offsets = [0, 64], sizes = [16, 32], strides = [1, 1]} : vector<16x256xf32> to vector<16x32xf32>
    %136 = vector.broadcast %134 : vector<16x1xf32> to vector<16x32xf32>
    %137 = arith.mulf %136, %135 : vector<16x32xf32>
    %138 = arith.addf %133, %137 : vector<16x32xf32>
    %139 = vector.extract_strided_slice %6 {offsets = [0, 3], sizes = [16, 1], strides = [1, 1]} : vector<16x8xf32> to vector<16x1xf32>
    %140 = vector.extract_strided_slice %124 {offsets = [0, 96], sizes = [16, 32], strides = [1, 1]} : vector<16x256xf32> to vector<16x32xf32>
    %141 = vector.broadcast %139 : vector<16x1xf32> to vector<16x32xf32>
    %142 = arith.mulf %141, %140 : vector<16x32xf32>
    %143 = arith.addf %138, %142 : vector<16x32xf32>
    %144 = vector.extract_strided_slice %6 {offsets = [0, 4], sizes = [16, 1], strides = [1, 1]} : vector<16x8xf32> to vector<16x1xf32>
    %145 = vector.extract_strided_slice %124 {offsets = [0, 128], sizes = [16, 32], strides = [1, 1]} : vector<16x256xf32> to vector<16x32xf32>
    %146 = vector.broadcast %144 : vector<16x1xf32> to vector<16x32xf32>
    %147 = arith.mulf %146, %145 : vector<16x32xf32>
    %148 = arith.addf %143, %147 : vector<16x32xf32>
    %149 = vector.extract_strided_slice %6 {offsets = [0, 5], sizes = [16, 1], strides = [1, 1]} : vector<16x8xf32> to vector<16x1xf32>
    %150 = vector.extract_strided_slice %124 {offsets = [0, 160], sizes = [16, 32], strides = [1, 1]} : vector<16x256xf32> to vector<16x32xf32>
    %151 = vector.broadcast %149 : vector<16x1xf32> to vector<16x32xf32>
    %152 = arith.mulf %151, %150 : vector<16x32xf32>
    %153 = arith.addf %148, %152 : vector<16x32xf32>
    %154 = vector.extract_strided_slice %6 {offsets = [0, 6], sizes = [16, 1], strides = [1, 1]} : vector<16x8xf32> to vector<16x1xf32>
    %155 = vector.extract_strided_slice %124 {offsets = [0, 192], sizes = [16, 32], strides = [1, 1]} : vector<16x256xf32> to vector<16x32xf32>
    %156 = vector.broadcast %154 : vector<16x1xf32> to vector<16x32xf32>
    %157 = arith.mulf %156, %155 : vector<16x32xf32>
    %158 = arith.addf %153, %157 : vector<16x32xf32>
    %159 = vector.extract_strided_slice %6 {offsets = [0, 7], sizes = [16, 1], strides = [1, 1]} : vector<16x8xf32> to vector<16x1xf32>
    %160 = vector.extract_strided_slice %124 {offsets = [0, 224], sizes = [16, 32], strides = [1, 1]} : vector<16x256xf32> to vector<16x32xf32>
    %161 = vector.broadcast %159 : vector<16x1xf32> to vector<16x32xf32>
    %162 = arith.mulf %161, %160 : vector<16x32xf32>
    %163 = arith.addf %158, %162 : vector<16x32xf32>
    %164 = vector.extract_strided_slice %64 {offsets = [0, 64], sizes = [16, 32], strides = [1, 1]} : vector<16x96xf32> to vector<16x32xf32>
    %165 = arith.addf %164, %163 : vector<16x32xf32>
    %166 = vector.extract_strided_slice %7 {offsets = [0, 64], sizes = [16, 32], strides = [1, 1]} : vector<16x96xf32> to vector<16x32xf32>
    %167 = arith.addf %165, %166 : vector<16x32xf32>
    %168 = math.tanh %167 : vector<16x32xf32>
    %169 = arith.mulf %114, %5 : vector<16x32xf32>
    %cst_42 = arith.constant 1.000000e+00 : f32
    %170 = vector.broadcast %cst_42 : f32 to vector<16x32xf32>
    %171 = arith.subf %170, %114 : vector<16x32xf32>
    %172 = arith.mulf %171, %168 : vector<16x32xf32>
    %173 = arith.addf %169, %172 : vector<16x32xf32>
    %c0_43 = arith.constant 0 : index
    %c0_44 = arith.constant 0 : index
    %174 = vector.load %arg11[%c0_43, %c0_44] : memref<16x32xf32, #tpu.memory_space<vmem>>, vector<16x32xf32>
    tpu.vector_store %arg11[%c0_43, %c0_44], %173 {strides = array<i32>} : memref<16x32xf32, #tpu.memory_space<vmem>>, vector<16x32xf32>,
    %c0_45 = arith.constant 0 : index
    %c0_46 = arith.constant 0 : index
    %c0_47 = arith.constant 0 : index
    %c0_48 = arith.constant 0 : index
    %175 = vector.load %arg10[%c0_45, %c0_46, %c0_47, %c0_48] : memref<1x1x16x32xf32, #tpu.memory_space<vmem>>, vector<1x1x16x32xf32>
    %176 = vector.shape_cast %175 : vector<1x1x16x32xf32> to vector<16x32xf32>
    %177 = vector.shape_cast %173 : vector<16x32xf32> to vector<1x1x16x32xf32>
    tpu.vector_store %arg10[%c0_45, %c0_46, %c0_47, %c0_48], %177 {strides = array<i32>} : memref<1x1x16x32xf32, #tpu.memory_space<vmem>>, vector<1x1x16x32xf32>,
    return
  }
  func.func @transform_0(%arg0: i32, %arg1: i32) -> (i32, i32, i32, i32) {
    %c0_i32 = arith.constant 0 : i32
    %c0_i32_0 = arith.constant 0 : i32
    %c0_i32_1 = arith.constant 0 : i32
    return %arg0, %arg1, %c0_i32, %c0_i32_0 : i32, i32, i32, i32
  }
  func.func @transform_1(%arg0: i32, %arg1: i32) -> (i32, i32, i32) {
    %c0_i32 = arith.constant 0 : i32
    %c0_i32_0 = arith.constant 0 : i32
    %c0_i32_1 = arith.constant 0 : i32
    return %arg0, %c0_i32, %c0_i32_0 : i32, i32, i32
  }
  func.func @transform_2(%arg0: i32, %arg1: i32) -> (i32, i32, i32) {
    %c0_i32 = arith.constant 0 : i32
    %c0_i32_0 = arith.constant 0 : i32
    %c0_i32_1 = arith.constant 0 : i32
    %c0_i32_2 = arith.constant 0 : i32
    return %c0_i32, %c0_i32_0, %c0_i32_1 : i32, i32, i32
  }
  func.func @transform_3(%arg0: i32, %arg1: i32) -> (i32, i32) {
    %c0_i32 = arith.constant 0 : i32
    %c0_i32_0 = arith.constant 0 : i32
    %c0_i32_1 = arith.constant 0 : i32
    return %c0_i32, %c0_i32_0 : i32, i32
  }
  func.func @transform_4(%arg0: i32, %arg1: i32) -> (i32, i32) {
    %c0_i32 = arith.constant 0 : i32
    %c0_i32_0 = arith.constant 0 : i32
    %c0_i32_1 = arith.constant 0 : i32
    return %c0_i32, %c0_i32_0 : i32, i32
  }
  func.func @transform_5(%arg0: i32, %arg1: i32) -> (i32, i32) {
    %c0_i32 = arith.constant 0 : i32
    %c0_i32_0 = arith.constant 0 : i32
    %c0_i32_1 = arith.constant 0 : i32
    return %c0_i32, %c0_i32_0 : i32, i32
  }
  func.func @transform_6(%arg0: i32, %arg1: i32) -> (i32, i32) {
    %c0_i32 = arith.constant 0 : i32
    %c0_i32_0 = arith.constant 0 : i32
    %c0_i32_1 = arith.constant 0 : i32
    return %c0_i32, %c0_i32_0 : i32, i32
  }
  func.func @transform_7(%arg0: i32, %arg1: i32) -> (i32, i32) {
    %c0_i32 = arith.constant 0 : i32
    %c0_i32_0 = arith.constant 0 : i32
    %c0_i32_1 = arith.constant 0 : i32
    return %c0_i32, %c0_i32_0 : i32, i32
  }
  func.func @transform_8(%arg0: i32, %arg1: i32) -> (i32, i32, i32, i32) {
    %c0_i32 = arith.constant 0 : i32
    %c0_i32_0 = arith.constant 0 : i32
    %c0_i32_1 = arith.constant 0 : i32
    return %arg0, %arg1, %c0_i32, %c0_i32_0 : i32, i32, i32, i32
  }
}

</mosaic_0001>

<bundles_post_ra>
// kernel: tpu_custom_call.1
= control target key start
LH: loop header
LB: loop body
LE: loop exit
PB: predicated region body
PF: predicated region fallthrough
CT: control target
= control target key end

     0   :  { %s3616_s0 = inlined_call_operand.vmem [shape: f32[2,4,16,4], index: 0, kind: input, shape index: {}]   ;;  %s3617_s1 = inlined_call_operand.hbm [shape: f32[2,16,32], index: 1, kind: input, shape index: {}]   ;;  %s3618_s2 = inlined_call_operand.hbm [shape: f32[2,16,16], index: 2, kind: input, shape index: {}]   ;;  %s3619_s3 = inlined_call_operand.vmem [shape: f32[16,8], index: 3, kind: input, shape index: {}]   ;;  %s3620_s4 = inlined_call_operand.hbm [shape: f32[12,768], index: 4, kind: input, shape index: {}]   ;;  %s3621_s5 = inlined_call_operand.hbm [shape: f32[96,512], index: 5, kind: input, shape index: {}]   ;;  %s3622_s6 = inlined_call_operand.vmem [shape: f32[96,256], index: 6, kind: input, shape index: {}]   ;;  %s3623_s7 = inlined_call_operand.vmem [shape: f32[16,96], index: 7, kind: input, shape index: {}]   ;;  %s3624_s8 = inlined_call_operand.hbm [shape: f32[2,4,16,32], index: 8, kind: output, shape index: {}]  }
   0x1   :  { %3646 = sst [smem:[#allocation19_spill]] %s3616_s0 }
   0x2   :  { %3647 = sst [smem:[#allocation20_spill]] %s3618_s2 }
   0x3   :  { %3648 = sst [smem:[#allocation21_spill]] %s3619_s3 }
   0x4   :  { %3649 = sst [smem:[#allocation22_spill]] %s3620_s4 }
   0x5   :  { %3650 = sst [smem:[#allocation23_spill]] %s3621_s5 }
   0x6   :  { %3651 = sst [smem:[#allocation24_spill]] %s3622_s6 }
   0x7   :  { %3652 = sst [smem:[#allocation25_spill]] %s3623_s7 }
   0x8   :  { %3653 = sst [smem:[#allocation26_spill]] %s3624_s8 }
   0x9   :  { %13 = vsyncpa [#allocation4], 0 }
   0xa   :  { %15 = vsyncpa [#allocation4 + $0x1], 0 }
   0xb   :  { %16 = vsyncpa [#allocation7], 0 }
   0xc   :  { %17 = vsyncpa [#allocation10], 0 }
   0xd   :  { %18 = vsyncpa [#allocation5], 0 }
   0xe   :  { %20 = vsyncpa [#allocation5 + $0x1], 0  ;;  %s2836_s27 = smov 0   ;;  %s2838_s28 = smov 0  }
   0xf   :  { %s2840_s29 = smov 0   ;;  %s2842_s30 = smov 0  }
  0x10   :  { %s2844_s9 = smov 0   ;;  %s2846_s10 = smov 0  }
  0x11   :  { %s2848_s11 = smov 0   ;;  %s2850_s12 = smov 0  }
  0x12   :  { %s2852_s13 = smov 0   ;;  %s2854_s14 = smov 0  }
  0x13   :  { %s2856_s15 = smov 0  }
  0x14 LB: > { %3654 = sst [smem:[#allocation16_spill]] %s2722_s27  ;;  %s2095_s16 = sadd.s32 4294967295, %s2762_s15   ;;  %s2762_s15 = sphi %s2856_s15, %s26_s15   ;;  %s2758_s14 = sphi %s2854_s14, %s3702_s14   ;;  %s2754_s13 = sphi %s2852_s13, %s3701_s13   ;;  %s2750_s12 = sphi %s2850_s12, %s3700_s12   ;;  %s2746_s11 = sphi %s2848_s11, %s3699_s11   ;;  %s2742_s10 = sphi %s2846_s10, %s3698_s10   ;;  %s2738_s9 = sphi %s2844_s9, %s3697_s9   ;;  %s2734_s30 = sphi %s2842_s30, %s3696_s30   ;;  %s2730_s29 = sphi %s2840_s29, %s3695_s29   ;;  %s2726_s28 = sphi %s2838_s28, %s3694_s28   ;;  %s2722_s27 = sphi %s2836_s27, %s3693_s27  }
  0x15   : > { %s2096_s17 = sadd.s32 4294967294, %s2762_s15   ;;  %p86_p0 = scmp.ne.s32.totalorder %s2738_s9, %s2734_s30 }
  0x16   : > { %p2892_p1 = scmp.eq.s32.totalorder %s2095_s16, 0  ;;  %p237_p2 = scmp.ne.s32.totalorder %s2730_s29, %s2726_s28 }
  0x17   : > { %p238_p4 = scmp.eq.s32.totalorder %s2095_s16, 7  ;;  %p243_p5 = scmp.ne.s32.totalorder %s2726_s28, %s2722_s27 }
  0x18   : > { %s3655_s18 = scalar_select %p2892_p1, 1, 0 }
  0x19   : > { %p2901_p3 = por %p2892_p1, %p86_p0  ;;  %p244_p6 = scmp.eq.s32.totalorder %s2096_s17, 7 }
  0x1a   : > { %p2907_p7 = por %p238_p4, %p237_p2  ;;  %p2097_p8 = scmp.ge.s32.totalorder %s2762_s15, 1 }
  0x1b   : > { %s3656_s20 = scalar_select %p2901_p3, 1, 0 }
  0x1c   : > { %s3657_s21 = scalar_select %p2907_p7, 1, 0 }
  0x1d   : > { %p2912_p9 = por %p244_p6, %p243_p5  ;;  %p251_p10 = scmp.lt.s32.totalorder %s2762_s15, 9 }
  0x1e   : > { %3658 = sst [smem:[#allocation17_spill]] %s3657_s21  ;;  %s2764_s24 = smov [#allocation6]  }
  0x1f   : > { %s3659_s22 = scalar_select %p2912_p9, 1, 0 }
  0x20   : > { %p2917_p11 = pnand %p2097_p8, %p251_p10  ;;  %s263_s25 = sshll.u32 %s2764_s24, 4  ;;  %s264_s25 = int_to_ptr.vmem [resolvable:$true] %s263_s25 }
  0x21   : > { %3660 = sst [smem:[#allocation18_spill]] %s3659_s22  ;;  %s2765_s30 = smov [#allocation8]  }
  0x22   : > { %s3661_s23 = scalar_select %p2917_p11, 1, 0 }
  0x23   : > { %p2350_p12 = pneg %p2917_p11  ;;  %s279_s16 = sshll.u32 %s2765_s30, 4  ;;  %s2929_s16 = int_to_ptr.vmem [resolvable:$true] %s279_s16 }
  0x24   : > { %s3663_s2 = sld [smem:[#allocation20_spill]] }
  0x25   : > { %p2925_p13 = pnand %p2350_p12, %p2892_p1 }
  0x27   : > { %p2939_p2 = pneg %p2925_p13 }
  0x2a   : > { %s2518_s22 = scalar_lea.hbm %s3663_s2, 512 }
  0x2b   : > { %p2519_p0 = scmp.ne.s32.totalorder %s3663_s2, %s2518_s22  ;;  %p2525_p6 = scmp.lt.u32.totalorder %s2518_s22, %s3663_s2 }
  0x2d   : > { %p2521_p4 = pnand %p2939_p2, %p2519_p0 }
  0x2f   : > { %p2522_p5 = pneg %p2521_p4 }
  0x31   : > { %p2527_p8 = pnand %p2525_p6, %p2522_p5 }
  0x33   : > { %2530 = shalt.err (!%p2527_p8)
}
  0x34   : > { %s2531_s19 = scalar_lea.vmem %s264_s25, 512  ;;  %p2539_p7 = scmp.lt.s32.totalorder %s264_s25, %s264_s25 }
  0x35   : > { %p2532_p10 = scmp.ne.s32.totalorder %s264_s25, %s2531_s19  ;;  %p2540_p1 = scmp.lt.s32.totalorder %s2531_s19, %s2531_s19 }
  0x37   : > { %p2534_p12 = pnand %p2532_p10, %p2939_p2  ;;  %p2541_p3 = por %p2540_p1, %p2539_p7 }
  0x39   : > { %p2535_p9 = pneg %p2534_p12 }
  0x3b   : > { %p2542_p11 = pnand %p2541_p3, %p2535_p9 }
  0x3d   : > { %2545 = shalt.err (!%p2542_p11)
}
  0x3e   : > { %s3638_s8 = smov 128   ;;  %s3639_s27 = smov 8  }
  0x3f   : > { %2353 = dma.hbm_to_vmem [thread:$0]  (!%p2925_p13), %s3663_s2, 512, %s264_s25, [#allocation7], %s3638_s8, %s3638_s8, %s3639_s27  }
  0x40   : > { %s3665_s4 = sld [smem:[#allocation22_spill]] }
  0x46   : > { %s2546_s6 = scalar_lea.hbm %s3665_s4, 1536 }
  0x47   : > { %p2547_p1 = scmp.ne.s32.totalorder %s3665_s4, %s2546_s6  ;;  %p2553_p9 = scmp.lt.u32.totalorder %s2546_s6, %s3665_s4 }
  0x49   : > { %p2549_p3 = pnand %p2547_p1, %p2939_p2 }
  0x4b   : > { %p2550_p7 = pneg %p2549_p3 }
  0x4d   : > { %p2555_p11 = pnand %p2553_p9, %p2550_p7 }
  0x4f   : > { %2558 = shalt.err (!%p2555_p11)
}
  0x50   : > { %s2559_s25 = scalar_lea.vmem %s2929_s16, 1536  ;;  %p2567_p6 = scmp.lt.s32.totalorder %s2929_s16, %s2929_s16 }
  0x51   : > { %p2560_p0 = scmp.ne.s32.totalorder %s2929_s16, %s2559_s25  ;;  %p2568_p8 = scmp.lt.s32.totalorder %s2559_s25, %s2559_s25 }
  0x53   : > { %p2562_p4 = pnand %p2560_p0, %p2939_p2  ;;  %p2569_p10 = por %p2568_p8, %p2567_p6 }
  0x55   : > { %p2563_p5 = pneg %p2562_p4 }
  0x57   : > { %p2570_p12 = pnand %p2569_p10, %p2563_p5 }
  0x59   : > { %2573 = shalt.err (!%p2570_p12)
}
  0x5a   : > { %s2768_s7 = smov 768   ;;  %s2769_s0 = smov 48  }
  0x5b   : > { %2356 = dma.hbm_to_vmem [thread:$0]  (!%p2925_p13), %s3665_s4, 1536, %s2929_s16, [#allocation7], %s2768_s7, %s2768_s7, %s2769_s0  }
  0x5c   : > { %s2770_s21 = smov [#allocation9]   ;;  %s3666_s5 = sld [smem:[#allocation23_spill]] }
  0x5d   : > { %s292_s22 = sshll.u32 %s2770_s21, 4  ;;  %s293_s22 = int_to_ptr.vmem [resolvable:$true] %s292_s22 }
  0x62   : > { %s2574_s19 = scalar_lea.hbm %s3666_s5, 6144 }
  0x63   : > { %p2575_p1 = scmp.ne.s32.totalorder %s3666_s5, %s2574_s19  ;;  %p2581_p9 = scmp.lt.u32.totalorder %s2574_s19, %s3666_s5 }
  0x65   : > { %p2577_p3 = pnand %p2575_p1, %p2939_p2 }
  0x67   : > { %p2578_p7 = pneg %p2577_p3 }
  0x69   : > { %p2583_p11 = pnand %p2581_p9, %p2578_p7 }
  0x6b   : > { %2586 = shalt.err (!%p2583_p11)
}
  0x6c   : > { %s2587_s16 = scalar_lea.vmem %s293_s22, 6144  ;;  %p2595_p6 = scmp.lt.s32.totalorder %s293_s22, %s293_s22 }
  0x6d   : > { %p2588_p0 = scmp.ne.s32.totalorder %s293_s22, %s2587_s16  ;;  %p2596_p8 = scmp.lt.s32.totalorder %s2587_s16, %s2587_s16 }
  0x6f   : > { %p2590_p4 = pnand %p2588_p0, %p2939_p2  ;;  %p2597_p10 = por %p2596_p8, %p2595_p6 }
  0x71   : > { %p2591_p5 = pneg %p2590_p4 }
  0x73   : > { %p2598_p12 = pnand %p2597_p10, %p2591_p5 }
  0x75   : > { %2601 = shalt.err (!%p2598_p12)
}
  0x76   : > { %s2771_s8 = smov 512   ;;  %s2772_s2 = smov 32  }
  0x77   : > { %2359 = dma.hbm_to_vmem [thread:$0]  (!%p2925_p13), %s3666_s5, 6144, %s293_s22, [#allocation10], %s2771_s8, %s2771_s8, %s2772_s2  }
  0x78   : > { %s35_s7 = sadd.s32 1, %s2754_s13  ;;  %s38_s0 = sadd.s32 1, %s2758_s14 }
  0x79   : > { %p36_p2 = scmp.ge.s32.totalorder %s35_s7, 4  ;;  %s73_s3 = sadd.s32 1, %s2742_s10 }
  0x7a   : > { %p80_p1 = scmp.ne.s32.totalorder %s2742_s10, %s2738_s9  ;;  %p81_p3 = scmp.eq.s32.totalorder %s2762_s15, 0 }
  0x7b   : > { %s3704_s7 = smov (%p36_p2, %s35_s7), 0  ;;  %s3706_s0 = smov (!%p36_p2, %s38_s0), %s2758_s14 }
  0x7c   : > { %s223_s26 = ssub.s32 %s2754_s13, %s3704_s7  ;;  %p40_p7 = scmp.ge.s32.totalorder %s3706_s0, 2 }
  0x7d   : > { %p2371_p9 = scmp.lt.s32.totalorder %s2762_s15, 8  ;;  %p3011_p13 = por %p81_p3, %p80_p1 }
  0x7e   : > { %s324_s21 = sand.u32 1, %s2742_s10   ;;  %s3708_s0 = smov (%p40_p7, %s3706_s0), 0 }
  0x7f   : > { %s2102_s22 = sshll.u32 %s324_s21, 4  ;;  %s70_s17 = ssub.s32 %s2758_s14, %s3708_s0 }
  0x80   : > { %p71_p11 = scmp.eq.s32.totalorder %s70_s17, 0  ;;  %s224_s30 = sor.u32 %s223_s26, %s70_s17 }
  0x81   : > { %p225_p0 = scmp.eq.s32.totalorder %s224_s30, 0  ;;  %s2153_s19 = sshll.u32 %s2758_s14, 8 }
  0x82   : > { %s3022_s25 = scalar_select %p71_p11, %s2742_s10, %s73_s3  }
  0x83   : > { %s3668_s16 = sadd.s32 1, %s2730_s29  ;;  %s3032_s27 = scalar_lea.hbm %s3617_s1, %s2153_s19 }
  0x84   : > { %s3027_s8 = scalar_select %p225_p0, %s2730_s29, %s3668_s16  }
  0x85   : > { %s328_s4 = scalar_lea.vmem [#allocation3], %s2102_s22  ;;  %p3040_p4 = pnand %p2371_p9, %p3011_p13 }
  0x86   : > { %s335_s5 = sshll.u32 %s328_s4, 4  ;;  %s3044_s26 = scalar_lea.sflag [#allocation4], %s324_s21  ;;  %s3034_s5 = int_to_ptr.vmem [resolvable:$true] %s335_s5 }
  0x87   : > { %s2602_s17 = scalar_lea.hbm %s3032_s27, 256  ;;  %p2604_p6 = pneg %p3040_p4 }
  0x88   : > { %p2603_p5 = scmp.ne.s32.totalorder %s3032_s27, %s2602_s17  ;;  %s2607_s6 = scalar_lea.hbm %s3617_s1, 512 }
  0x89   : > { %p2608_p12 = scmp.lt.u32.totalorder %s3032_s27, %s3617_s1  ;;  %p2609_p2 = scmp.lt.u32.totalorder %s2607_s6, %s2602_s17 }
  0x8a   : > { %p2605_p8 = pnand %p2604_p6, %p2603_p5  ;;  %p2611_p3 = scmp.lt.u32.totalorder %s2602_s17, %s3032_s27 }
  0x8b   : > { %p2610_p1 = por %p2609_p2, %p2608_p12 }
  0x8c   : > { %p2606_p10 = pneg %p2605_p8 }
  0x8d   : > { %p2612_p7 = por %p2611_p3, %p2610_p1 }
  0x8f   : > { %p2613_p9 = pnand %p2612_p7, %p2606_p10 }
  0x91   : > { %2616 = shalt.err (!%p2613_p9)
}
  0x92   : > { %s2617_s21 = scalar_lea.vmem %s3034_s5, 256  ;;  %s2773_s16 = smov [#allocation3]  }
  0x93   : > { %p2618_p13 = scmp.ne.s32.totalorder %s3034_s5, %s2617_s21  ;;  %s2622_s2 = sshll.u32 %s2773_s16, 4  ;;  %s2623_s2 = int_to_ptr.vmem [resolvable:$false] %s2622_s2 }
  0x94   : > { %s2624_s24 = scalar_lea.vmem %s2623_s2, 512  ;;  %p2625_p5 = scmp.lt.s32.totalorder %s3034_s5, %s2623_s2 }
  0x95   : > { %p2620_p11 = pnand %p2618_p13, %p2604_p6  ;;  %p2626_p8 = scmp.lt.s32.totalorder %s2624_s24, %s2617_s21 }
  0x97   : > { %p2621_p0 = pneg %p2620_p11  ;;  %p2627_p12 = por %p2626_p8, %p2625_p5 }
  0x99   : > { %p2628_p2 = pnand %p2627_p12, %p2621_p0 }
  0x9b   : > { %2631 = shalt.err (!%p2628_p2)
}
  0x9c   : > { %s3670_s17 = smov 8   ;;  %s3671_s4 = smov 128  }
  0x9d   : > { %2363 = dma.hbm_to_vmem [thread:$0]  (!%p3040_p4), %s3032_s27, 256, %s3034_s5, %s3044_s26, %s3671_s4, %s3671_s4, %s3670_s17  }
  0x9e   : > { %p3672_p6 = scmp.ne.s32.totalorder %s3661_s23, 0 }
  0x9f   : > { %s349_s22 = sand.u32 (!%p3672_p6), 1, %s2738_s9   ;;  %p3673_p10 = scmp.ne.s32.totalorder (!%p3672_p6), %s3656_s20, 0 }
  0xa0   : > { %347 = sbr.rel (%p3672_p6) target bundleno = 2020 (0x7e4), region = 52  ;;  %s2106_s6 = sshll.u32 (!%p3672_p6), %s349_s22, 4 }
  0xa1   : > { %s350_s30 = scalar_lea.sflag (!%p3672_p6), [#allocation4], %s349_s22  ;;  %s353_s19 = scalar_lea.vmem (!%p3672_p6), [#allocation3], %s2106_s6 }
  0xa7   : > { %2705 = dma.done.wait (%p3673_p10), %s350_s30, 256  }
  0xa8   : > { %2707 = vsyncadd (%p3673_p10), %s350_s30, 4294967040  ;;  %p3674_p1 = scmp.ne.s32.totalorder %s3655_s18, 0 }
  0xaa   : > { %2709 = dma.done.wait (%p3674_p1), [#allocation7], 2048  }
  0xab   : > { %2711 = vsyncadd (%p3674_p1), [#allocation7], 4294965248 }
  0xac   : > { %2713 = dma.done.wait (%p3674_p1), [#allocation10], 6144  }
  0xad   : > { %2715 = vsyncadd (%p3674_p1), [#allocation10], 4294961152  ;;  %s3641_s5 = sand.u32 1, %s2726_s28   ;;  %p407_p4 = scmp.lt.s32.totalorder %s2750_s12, 1 }
  0xae   : > { %s2110_s20 = sshll.u32 %s3641_s5, 4  ;;  %p409_p3 = scmp.lt.s32.totalorder %s2746_s11, 3 }
  0xaf   : > { %s408_s23 = scalar_select %p407_p4, %s2750_s12, 1 }
  0xb0   : > { %s410_s27 = scalar_select %p409_p3, %s2746_s11, 3 }
  0xb1   : > { %s2112_s3 = sshll.u32 %s408_s23, 3  ;;  %s3675_s24 = sld [smem:[#allocation19_spill]] }
  0xb2   : > { %s2111_s26 = sshll.u32 %s410_s27, 1  ;;  %s3100_s4 = scalar_lea.vmem [#allocation11], %s2110_s20 }
  0xb3   : > { %s413_s21 = sadd.s32 %s2112_s3, %s2111_s26  ;;  %p2114_p7 = scmp.ne.s32.totalorder %s2746_s11, 0 }
  0xb4   : > { %s2113_s16 = sshll.u32 %s413_s21, 3  ;;  %v420_v0 = vld [vmem:[%s353_s19] sm:$0xff] (!%p2114_p7)  ;;  %vm422_vm0 = vcmask (!%p2114_p7), 261120   ;;  %v421_v1 = vld [vmem:[%s353_s19 + $0x8] sm:$0xff] (!%p2114_p7) }
  0xb5   : > { %419 = sbr.rel (%p2114_p7) target bundleno = 188 (0xbc), region = 72  ;;  %423 = vst.msk [vmem:[#allocation2] sm:$0xff] (!%p2114_p7), %vm422_vm0, %v420_v0  ;;  %424 = vst.msk [vmem:[#allocation2 + $0x8] sm:$0xff] (!%p2114_p7), %vm422_vm0, %v421_v1 }
  0xb7   : > { %s415_s17 = scalar_lea.vmem %s3675_s24, %s2113_s16 }
  0xbc PF: > { %v3103_v2 = vld [vmem:[%s415_s17] sm:$0xff]  ;;  %v3105_v3 = vld [vmem:[%s415_s17 + $0x8] sm:$0xff]  ;;  %v3107_v4 = vld [vmem:[#allocation6] sm:$0xff]  ;;  %vm435_vm1 = vcmask 130048   ;;  %vm814_vm2 = vcmask 1043456   ;;  %vm2774_vm3 = vmmov 1  }
  0xbd   : > { %v2220_v5 = vpack.c.bf16 %v3105_v3, %v3103_v2  ;;  %2182 = vmatprep.mubr.msk.f32.mxu1 %vm435_vm1, %v3107_v4  ;;  %2196 = vmatprep.mubr.msk.f32.mxu0 %vm435_vm1, %v3107_v4  ;;  %v3115_v6 = vld [vmem:[#allocation2] sm:$0xff]  ;;  %v3117_v7 = vld [vmem:[#allocation2 + $0x8] sm:$0xff]  ;;  %v3121_v9 = vld [vmem:[#allocation6 + $0x8] sm:$0xff]  ;;  %v2775_v28 = vmov 0.0   ;;  %s2776_s22 = smov 4   ;;  %s3640_s6 = smov 8  }
  0xbe   : > { %v2228_v8 = vpack.c.bf16 %v3117_v7, %v3115_v6  ;;  %v3123_v10 = vld [vmem:[#allocation6 + $0x10] sm:$0xff]  ;;  %v3129_v11 = vld [vmem:[#allocation6 + $0x18] sm:$0xff]  ;;  %v800_v12 = vld [vmem:[#allocation8 + $0x28] sm:$0xff]  ;;  %s2778_s30 = smov 32   ;;  %s3644_s19 = smov 64   ;;  %v2780_v41 = vmov 1  }
  0xbf   : > { %2221 = vmatprep.subr.bf16.mxu1 %v2220_v5  ;;  %v806_v13 = vld [vmem:[#allocation8 + $0x58] sm:$0xf]  ;;  %v796_v15 = vld [vmem:[#allocation8 + $0x8] sm:$0xff]  ;;  %v799_v17 = vld [vmem:[#allocation8 + $0x20] sm:$0xff]  ;;  %s3678_s27 = sld [smem:[#allocation21_spill]]  ;;  %2490 = vset.pattern.permute.xlu1 %v2780_v41  ;;  %v2781_v43 = vmov 2  }
  0xc0   : > { %2223 = vmatpush3.bf16.msra.mxu1 %v2220_v5  ;;  %2229 = vmatprep.subr.bf16.mxu0 %v2228_v8  ;;  %v2248_v14 = vpack.c.bf16 %v806_v13, %v800_v12  ;;  %v802_v16 = vld [vmem:[#allocation8 + $0x38] sm:$0xf]  ;;  %vm3139_vm4 = vmpackc.low %vm814_vm2, %vm2774_vm3  ;;  %v805_v20 = vld [vmem:[#allocation8 + $0x50] sm:$0xf]  ;;  %v2782_v44 = vmov 3   ;;  %v2783_v45 = vmov 5  }
  0xc1   : > { %2225 = vmatprep.subr.bf16.mxu1 %v2220_v5  ;;  %2231 = vmatpush3.bf16.msra.mxu0 %v2228_v8  ;;  %v2236_v19 = vpack.c.bf16 %v802_v16, %v796_v15  ;;  %v795_v21 = vld [vmem:[#allocation8] sm:$0xff]  ;;  %v2251_v22 = vpack.c.bf16 %v805_v20, %v799_v17  ;;  %v801_v23 = vld [vmem:[#allocation8 + $0x30] sm:$0xf]  ;;  %v1067_v25 = vld [vmem:[#allocation9 + $0x18] sm:$0xff]  ;;  %v2784_v46 = vmov 6   ;;  %v2785_v47 = vmov 0  }
  0xc2   : > { %2250 = vmatprep.subr.msk.bf16.mxu0 %vm3139_vm4, %v2248_v14  ;;  %v2239_v24 = vpack.c.bf16 %v801_v23, %v795_v21  ;;  %v1071_v26 = vld [vmem:[#allocation9 + $0x38] sm:$0xff]  ;;  %v804_v30 = vld [vmem:[#allocation8 + $0x48] sm:$0xf]  ;;  %2489 = vset.pattern.permute.xlu0 %v2780_v41  ;;  %v2786_v48 = vmov 4   ;;  %v2787_v49 = vmov 7   ;;  %v1066_v52 = vld [vmem:[#allocation9 + $0x10] sm:$0xff] }
  0xc3   : > { %2183 = vmatmul.mubr.msk.f32.vlgmr.msra.gmra.mrb[0].mxu1 %vm435_vm1, %v3121_v9  ;;  %v2278_v27 = vpack.c.bf16 %v1071_v26, %v1067_v25  ;;  %v798_v29 = vld [vmem:[#allocation8 + $0x18] sm:$0xff]  ;;  %v1070_v53 = vld [vmem:[#allocation9 + $0x30] sm:$0xff]  ;;  %vm617_vm5 = vcmask 31744   ;;  %vm620_vm6 = vcmask 64512   ;;  %v803_v57 = vld [vmem:[#allocation8 + $0x40] sm:$0xf] }
  0xc4   : > { %2227 = vmatpush3.bf16.msra.mxu1 %v2220_v5  ;;  %2189 = vmatprep.mubr.msk.f32.mxu1 %vm435_vm1, %v3123_v10  ;;  %v2242_v31 = vpack.c.bf16 %v804_v30, %v798_v29  ;;  %v1075_v54 = vld [vmem:[#allocation9 + $0x58] sm:$0xff]  ;;  %v797_v56 = vld [vmem:[#allocation8 + $0x10] sm:$0xff]  ;;  %vm807_vm7 = vcmask 97280   ;;  %v2280_v58 = vpack.c.bf16 %v1070_v53, %v1066_v52  ;;  %v1065_v0 = vld [vmem:[#allocation9 + $0x8] sm:$0xff]  ;;  %vm789_vm8 = vcmask 261120   ;;  %s3642_s16 = smov 96  }
  0xc5   : > { %2233 = vmatprep.subr.bf16.mxu1 %v2228_v8  ;;  %2197 = vmatmul.mubr.msk.f32.vlgmr.msra.gmra.mrb[0].mxu0 %vm435_vm1, %v3121_v9  ;;  %s3679_s3 = smov %s3678_s27  ;;  %v430_v40 = vld [vmem:[%s3678_s27 + $0x8] sm:$0xff]  ;;  %v1074_v62 = vld [vmem:[#allocation9 + $0x50] sm:$0xff]  ;;  %v2245_v5 = vpack.c.bf16 %v803_v57, %v797_v56  ;;  %v1064_v15 = vld [vmem:[#allocation9] sm:$0xff]  ;;  %vm792_vm9 = vcmask 523264   ;;  %vm1112_vm10 = vcmask 785408   ;;  %s3680_s24 = sld [smem:[#allocation25_spill]] }
  0xc6   : > { %2253 = vmatpush1.bf16.msk.msra.mxu0 %vm3139_vm4, %v2251_v22  ;;  %1051 = vmatprep.mubr.f32.mxu0 %v2775_v28  ;;  %v429_v42 = vld [vmem:[%s3679_s3] sm:$0xff]  ;;  %v1079_v55 = vld [vmem:[#allocation9 + $0x78] sm:$0xff]  ;;  %v1068_v20 = vld [vmem:[#allocation9 + $0x20] sm:$0xff]  ;;  %s3681_s27 = sld [smem:[#allocation24_spill]]  ;;  %s3683_s23 = smov 64  }
  0xc7   : > { %2190 = vmatmul.mubr.msk.f32.vlgmr.msra.gmra.mrb[2].mxu1 %vm435_vm1, %v3129_v11  ;;  %2279 = vmatprep.subr.bf16.mxu0 %v2278_v27  ;;  %v2282_v61 = vpack.c.bf16 %v1079_v55, %v1075_v54  ;;  %v1078_v63 = vld [vmem:[#allocation9 + $0x70] sm:$0xff]  ;;  %v1083_v12 = vld [vmem:[#allocation9 + $0x98] sm:$0xff]  ;;  %v1077_v25 = vld [vmem:[#allocation9 + $0x68] sm:$0xff]  ;;  %v2256_v27 = vpack.c.bf16 %v1068_v20, %v1064_v15  ;;  %s3685_s21 = sld [smem:[#allocation17_spill]]  ;;  %s2149_s2 = sshll.u32 %s2750_s12, 3 }
  0xc8   : > { %2235 = vmatpush3.bf16.msra.mxu1 %v2228_v8  ;;  %2203 = vmatprep.mubr.msk.f32.mxu1 %vm435_vm1, %v3123_v10  ;;  %v1069_v8 = vld [vmem:[#allocation9 + $0x28] sm:$0xff]  ;;  %v1087_v13 = vld [vmem:[#allocation9 + $0xb8] sm:$0xff]  ;;  %v1082_v21 = vld [vmem:[#allocation9 + $0x90] sm:$0xff]  ;;  %s1958_s5 = sshll.u32 %s3100_s4, 4  ;;  %s3686_s17 = sld [smem:[#allocation26_spill]]  ;;  %s3547_s5 = int_to_ptr.vmem [resolvable:$true] %s1958_s5 }
  0xc9   : > { %2238 = vmatprep.subr.msk.bf16.mxu1 %vm3139_vm4, %v2236_v19  ;;  %v2254_v17 = vpack.c.bf16 %v1069_v8, %v1065_v0  ;;  %v2286_v19 = vpack.c.bf16 %v1087_v13, %v1083_v12  ;;  %v1086_v22 = vld [vmem:[#allocation9 + $0xb0] sm:$0xff]  ;;  %v1095_v26 = vld [vmem:[#allocation9 + $0xf8] sm:$0xff]  ;;  %v1072_v30 = vld [vmem:[#allocation9 + $0x40] sm:$0xff]  ;;  %s2632_s20 = scalar_lea.vmem %s3547_s5, 256 }
  0xca   : > { %v2288_v29 = vpack.c.bf16 %v1086_v22, %v1082_v21  ;;  %v1090_v18 = vld [vmem:[#allocation9 + $0xd0] sm:$0xff]  ;;  %v1080_v41 = vld [vmem:[#allocation9 + $0x80] sm:$0xff]  ;;  %p2633_p9 = scmp.ne.s32.totalorder %s3547_s5, %s2632_s20 }
  0xcb   : > { %2204 = vmatmul.mubr.msk.f32.vlgmr.msra.gmra.mrb[4].mxu1 %vm435_vm1, %v3129_v11  ;;  %v1088_v53 = vld [vmem:[#allocation9 + $0xc0] sm:$0xff] }
  0xcc   : > { %2241 = vmatpush1.bf16.msk.msra.mxu1 %vm3139_vm4, %v2239_v24  ;;  %897 = vmatprep.mubr.f32.mxu1 %v2775_v28  ;;  %v1073_v24 = vld [vmem:[#allocation9 + $0x48] sm:$0xff]  ;;  %v1092_v57 = vld [vmem:[#allocation9 + $0xe0] sm:$0xff]  ;;  %s3682_s26 = smov %s3681_s27 }
  0xcd   : > { %2244 = vmatprep.subr.msk.bf16.mxu1 %vm3139_vm4, %v2242_v31  ;;  %v1076_v31 = vld [vmem:[#allocation9 + $0x60] sm:$0xff]  ;;  %p3688_p13 = scmp.ne.s32.totalorder %s3685_s21, 0 }
  0xce   : > { %v1096_v8 = vld [vmem:[#allocation9 + $0x100] sm:$0xff] }
  0xcf   : > { %v1100_v12 = vld [vmem:[#allocation9 + $0x120] sm:$0xff]  ;;  %p2634_p11 = pnand %p2633_p9, %p3688_p13 }
  0xd0   : > { %v1104_v21 = vld [vmem:[#allocation9 + $0x140] sm:$0xff] }
  0xd1   : > { %v1108_v22 = vld [vmem:[#allocation9 + $0x160] sm:$0xff]  ;;  %p2635_p0 = pneg %p2634_p11 }
 0x196   : > { %v2184_v32 = vpop.f32.mrb[0].mxu1 }
 0x197   : > { %605 = vrot.lane.b32.xlu1 %v2184_v32, %s2776_s22  ;;  %v508_v33 = vpop.f32.mrb[1].mxu1  ;;  %v2258_v32 = vpack.c.bf16 %v1077_v25, %v1073_v24  ;;  %v2276_v24 = vpack.c.bf16 %v1108_v22, %v1104_v21 }
 0x198   : > { %603 = vrot.lane.b32.xlu0 %v508_v33, %s2776_s22  ;;  %v2198_v34 = vpop.f32.mrb[0].mxu0  ;;  %v1094_v33 = vld [vmem:[#allocation9 + $0xf0] sm:$0xff] }
 0x199   : > { %v689_v35 = vpop.f32.mrb[1].mxu0 }
 0x19a   : > { %v2191_v36 = vpop.f32.mrb[2].mxu1 }
 0x19b   : > { %613 = vrot.lane.b32.xlu1 %v2191_v36, %s3640_s6  ;;  %v592_v37 = vpop.f32.mrb[3].mxu1  ;;  %v1085_v36 = vld [vmem:[#allocation9 + $0xa8] sm:$0xff] }
 0x19c   : > { %611 = vrot.lane.b32.xlu0 %v592_v37, %s3640_s6  ;;  %v1099_v37 = vld [vmem:[#allocation9 + $0x118] sm:$0xff] }
 0x19e   : > { %v2205_v38 = vpop.f32.mrb[4].mxu1 }
 0x19f   : > { %v764_v39 = vpop.f32.mrb[5].mxu1 }
 0x1a0   : > { %775 = vrot.lane.b32.xlu0 %v689_v35, %s2778_s30  ;;  %783 = vrot.lane.b32.xlu1 %v764_v39, %s3644_s19  ;;  %v2260_v39 = vpack.c.bf16 %v1076_v31, %v1072_v30 }
 0x1a4   : > { %777 = vrot.lane.b32.xlu0 %v2198_v34, %s2778_s30  ;;  %785 = vrot.lane.b32.xlu1 %v2205_v38, %s3644_s19  ;;  %v1081_v34 = vld [vmem:[#allocation9 + $0x88] sm:$0xff]  ;;  %v1103_v38 = vld [vmem:[#allocation9 + $0x138] sm:$0xff] }
 0x1a8   : > { %1290 = vperm.xlu1 %2490, %v430_v40   ;;  %1286 = vperm.xlu0 %2489, %v429_v42  }
 0x1ac   : > { %2491 = vset.pattern.permute.xlu1 %v2781_v43  ;;  %2492 = vset.pattern.permute.xlu0 %v2781_v43  ;;  %v2262_v43 = vpack.c.bf16 %v1085_v36, %v1081_v34 }
 0x1ad   : > { %1316 = vperm.xlu1 %2491, %v429_v42   ;;  %1320 = vperm.xlu0 %2492, %v430_v40  }
 0x1b1   : > { %2493 = vset.pattern.permute.xlu1 %v2782_v44  ;;  %2494 = vset.pattern.permute.xlu0 %v2783_v45  ;;  %v2294_v44 = vpack.c.bf16 %v1103_v38, %v1099_v37 }
 0x1b2   : > { %1346 = vperm.xlu1 %2493, %v429_v42   ;;  %1378 = vperm.xlu0 %2494, %v429_v42  }
 0x1b6   : > { %1350 = vperm.xlu1 %2493, %v430_v40   ;;  %2497 = vset.pattern.permute.xlu0 %v2784_v46 }
 0x1b7   : > { %1412 = vperm.xlu0 %2497, %v430_v40  }
 0x1ba   : > { %2495 = vset.pattern.permute.xlu1 %v2783_v45  ;;  %v1098_v45 = vld [vmem:[#allocation9 + $0x110] sm:$0xff] }
 0x1bb   : > { %1382 = vperm.xlu1 %2495, %v430_v40   ;;  %2499 = vset.pattern.permute.xlu0 %v2785_v47 }
 0x1bc   : > { %1275 = vperm.xlu0 %2499, %v429_v42  }
 0x1bf   : > { %2496 = vset.pattern.permute.xlu1 %v2784_v46  ;;  %v1102_v46 = vld [vmem:[#allocation9 + $0x130] sm:$0xff] }
 0x1c0   : > { %1408 = vperm.xlu1 %2496, %v429_v42   ;;  %2502 = vset.pattern.permute.xlu0 %v2786_v48  ;;  %v2296_v52 = vpack.c.bf16 %v1102_v46, %v1098_v45 }
 0x1c1   : > { %1370 = vperm.xlu0 %2502, %v430_v40  }
 0x1c4   : > { %2498 = vset.pattern.permute.xlu1 %v2787_v49 }
 0x1c5   : > { %1438 = vperm.xlu1 %2498, %v429_v42   ;;  %2503 = vset.pattern.permute.xlu0 %v2787_v49  ;;  %v1107_v49 = vld [vmem:[#allocation9 + $0x158] sm:$0xff] }
 0x1c9   : > { %1442 = vperm.xlu1 %2498, %v430_v40  }
 0x1cd   : > { %2500 = vset.pattern.permute.xlu1 %v2785_v47  ;;  %v1089_v47 = vld [vmem:[#allocation9 + $0xc8] sm:$0xff] }
 0x1ce   : > { %1280 = vperm.xlu1 %2500, %v430_v40   ;;  %v2292_v40 = vpack.c.bf16 %v1094_v33, %v1090_v18 }
 0x1d2   : > { %2501 = vset.pattern.permute.xlu1 %v2786_v48  ;;  %v1093_v48 = vld [vmem:[#allocation9 + $0xe8] sm:$0xff] }
 0x1d3   : > { %1366 = vperm.xlu1 %2501, %v429_v42   ;;  %v1084_v42 = vld [vmem:[#allocation9 + $0xa0] sm:$0xff]  ;;  %v2266_v55 = vpack.c.bf16 %v1093_v48, %v1089_v47 }
 0x209   : > { %v606_v50 = vpop.permute.xlu1 %605 }
 0x20a   : > { %v604_v51 = vpop.permute.xlu0 %603  ;;  %v619_v16 = vsel %vm617_vm5, %v3105_v3, %v606_v50  ;;  %v1091_v3 = vld [vmem:[#allocation9 + $0xd8] sm:$0xff] }
 0x20b   : > { %v618_v59 = vsel %vm617_vm5, %v3103_v2, %v604_v51  ;;  %v2284_v2 = vpack.c.bf16 %v1078_v63, %v1074_v62  ;;  %v2290_v35 = vpack.c.bf16 %v1095_v26, %v1091_v3  ;;  %v1111_v50 = vld [vmem:[#allocation9 + $0x178] sm:$0xff]  ;;  %v2264_v51 = vpack.c.bf16 %v1084_v42, %v1080_v41 }
 0x20c   : > { %v2298_v56 = vpack.c.bf16 %v1111_v50, %v1107_v49  ;;  %v2268_v63 = vpack.c.bf16 %v1092_v57, %v1088_v53 }
 0x20d   : > { %v614_v14 = vpop.permute.xlu1 %613 }
 0x20e   : > { %v612_v60 = vpop.permute.xlu0 %611  ;;  %v622_v23 = vsel %vm620_vm6, %v619_v16, %v614_v14  ;;  %v1105_v14 = vld [vmem:[#allocation9 + $0x148] sm:$0xff]  ;;  %v2272_v16 = vpack.c.bf16 %v1100_v12, %v1096_v8 }
 0x20f   : > { %v621_v1 = vsel %vm620_vm6, %v618_v59, %v612_v60  ;;  %v1110_v59 = vld [vmem:[#allocation9 + $0x170] sm:$0xff]  ;;  %v1097_v60 = vld [vmem:[#allocation9 + $0x108] sm:$0xff] }
 0x210   : > { %2125 = vmatmul.mubr.msk.f32.vlgmr.msra.gmra.mrb[6].mxu1 %vm807_vm7, %v621_v1  ;;  %2133 = vmatmul.mubr.msk.f32.vlgmr.msra.gmra.mrb[2].mxu0 %vm807_vm7, %v621_v1 }
 0x211   : > { %2281 = vmatpush1.bf16.msra.mxu0 %v2280_v58  ;;  %903 = vmatprep.mubr.f32.mxu1 %v2775_v28  ;;  %v1106_v58 = vld [vmem:[#allocation9 + $0x150] sm:$0xff] }
 0x212   : > { %1057 = vmatprep.mubr.f32.mxu0 %v2775_v28  ;;  %2283 = vmatprep.subr.bf16.mxu0 %v2282_v61  ;;  %v776_v54 = vpop.permute.xlu0 %775  ;;  %v1101_v61 = vld [vmem:[#allocation9 + $0x128] sm:$0xff]  ;;  %v784_v62 = vpop.permute.xlu1 %783  ;;  %v2300_v0 = vpack.c.bf16 %v1110_v59, %v1106_v58 }
 0x213   : > { %2247 = vmatpush1.bf16.msk.msra.mxu1 %vm3139_vm4, %v2245_v5  ;;  %v2270_v5 = vpack.c.bf16 %v1101_v61, %v1097_v60 }
 0x214   : > { %2126 = vmatmul.mubr.msk.f32.gmra.mrb[8].mxu1 %vm807_vm7, %v622_v23  ;;  %2134 = vmatmul.mubr.msk.f32.gmra.mrb[4].mxu0 %vm807_vm7, %v622_v23 }
 0x215   : > { %2285 = vmatpush1.bf16.msra.mxu0 %v2284_v2  ;;  %974 = vmatprep.mubr.f32.mxu1 %v2775_v28  ;;  %v1109_v2 = vld [vmem:[#allocation9 + $0x168] sm:$0xff] }
 0x216   : > { %2255 = vmatprep.subr.bf16.mxu1 %v2254_v17  ;;  %2287 = vmatprep.subr.bf16.mxu0 %v2286_v19  ;;  %v778_v13 = vpop.permute.xlu0 %777  ;;  %v786_v19 = vpop.permute.xlu1 %785  ;;  %v2274_v20 = vpack.c.bf16 %v1109_v2, %v1105_v14 }
 0x217   : > { %1260 = vmatprep.mubr.f32.mxu0 %v2775_v28  ;;  %v791_v17 = vsel %vm789_vm8, %v3117_v7, %v778_v13 }
 0x218   : > { %2129 = vmatmul.mubr.msk.f32.vlgmr.msra.gmra.mrb[10].mxu1 %vm807_vm7, %v621_v1  ;;  %v790_v1 = vsel %vm789_vm8, %v3115_v6, %v776_v54 }
 0x219   : > { %2257 = vmatpush1.bf16.msra.mxu1 %v2256_v27  ;;  %2289 = vmatpush1.bf16.msra.mxu0 %v2288_v29  ;;  %v793_v15 = vsel %vm792_vm9, %v790_v1, %v784_v62 }
 0x21a   : > { %980 = vmatprep.mubr.f32.mxu1 %v2775_v28  ;;  %2259 = vmatprep.subr.bf16.mxu1 %v2258_v32 }
 0x21b   : > { %2291 = vmatprep.subr.bf16.mxu0 %v2290_v35 }
 0x21c   : > { %2130 = vmatmul.mubr.msk.f32.gmra.mrb[12].mxu1 %vm807_vm7, %v622_v23  ;;  %v794_v23 = vsel %vm792_vm9, %v791_v17, %v786_v19 }
 0x21d   : > { %2261 = vmatpush1.bf16.msra.mxu1 %v2260_v39  ;;  %2293 = vmatpush1.bf16.msra.mxu0 %v2292_v40 }
 0x21e   : > { %2263 = vmatprep.subr.bf16.mxu1 %v2262_v43  ;;  %2295 = vmatprep.subr.bf16.mxu0 %v2294_v44 }
 0x21f   : > { %1183 = vmatprep.mubr.f32.mxu1 %v2775_v28 }
 0x221   : > { %2265 = vmatpush1.bf16.msra.mxu1 %v2264_v51  ;;  %2297 = vmatpush1.bf16.msra.mxu0 %v2296_v52 }
 0x222   : > { %2267 = vmatprep.subr.bf16.mxu1 %v2266_v55  ;;  %2299 = vmatprep.subr.bf16.mxu0 %v2298_v56 }
 0x225   : > { %2269 = vmatpush1.bf16.msra.mxu1 %v2268_v63  ;;  %2301 = vmatpush1.bf16.msra.mxu0 %v2300_v0 }
 0x226   : > { %2271 = vmatprep.subr.bf16.mxu1 %v2270_v5 }
 0x227   : > { %v3202_v25 = vpop.permute.xlu1 %1290  ;;  %v3210_v29 = vpop.permute.xlu0 %1286 }
 0x228   : > { %2137 = vmatmul.mubr.msk.f32.vlgmr.msra.gmra.mrb[6].mxu0 %vm1112_vm10, %v793_v15 }
 0x229   : > { %2273 = vmatpush1.bf16.msra.mxu1 %v2272_v16  ;;  %1266 = vmatprep.mubr.f32.mxu0 %v2775_v28 }
 0x22a   : > { %2275 = vmatprep.subr.bf16.mxu1 %v2274_v20 }
 0x22c   : > { %2138 = vmatmul.mubr.msk.f32.gmra.mrb[8].mxu0 %vm1112_vm10, %v794_v23  ;;  %v3204_v3 = vpop.permute.xlu1 %1316  ;;  %v3214_v31 = vpop.permute.xlu0 %1320 }
 0x22d   : > { %2277 = vmatpush1.bf16.msra.mxu1 %v2276_v24  ;;  %1801 = vmatprep.mubr.f32.mxu0 %v2775_v28 }
 0x230   : > { %2135 = vmatmul.mubr.msk.f32.vlgmr.msra.gmra.mrb[14].mxu1 %vm1112_vm10, %v793_v15 }
 0x231   : > { %1189 = vmatprep.mubr.f32.mxu1 %v2775_v28  ;;  %v3206_v26 = vpop.permute.xlu1 %1346  ;;  %v3225_v37 = vpop.permute.xlu0 %1378 }
 0x234   : > { %2136 = vmatmul.mubr.msk.f32.gmra.mrb[16].mxu1 %vm1112_vm10, %v794_v23 }
 0x235   : > { %2210 = vmatprep.mubr.msk.f32.mxu1 %vm435_vm1, %v3107_v4  ;;  %v3208_v27 = vpop.permute.xlu1 %1350 }
 0x236   : > { %v3244_v48 = vpop.permute.xlu0 %1412 }
 0x23a   : > { %v3212_v30 = vpop.permute.xlu1 %1382 }
 0x23f   : > { %v3216_v32 = vpop.permute.xlu1 %1408 }
 0x244   : > { %v3304_v19 = vpop.permute.xlu1 %1438 }
 0x248   : > { %v3318_v24 = vpop.permute.xlu1 %1442 }
 0x2e3   : > { %v1053_v18 = vpop.f32.mrb[2].mxu0  ;;  %v3218_v33 = vpop.f32.mrb[6].mxu1 }
 0x2e4   : > { %v1415_v4 = vmul.f32 %v3216_v32, %v1053_v18  ;;  %v1293_v34 = vmul.f32 %v3210_v29, %v3218_v33  ;;  %v901_v35 = vpop.f32.mrb[7].mxu1  ;;  %v3223_v36 = vpop.f32.mrb[3].mxu0  ;;  %v1386_v40 = vmul.f32 %v3225_v37, %v1053_v18 }
 0x2e5   : > { %v1323_v41 = vmul.f32 %v3204_v3, %v901_v35  ;;  %v1294_v45 = vmul.f32 %v3210_v29, %v901_v35  ;;  %v1416_v50 = vmul.f32 %v3216_v32, %v3223_v36  ;;  %v1445_v20 = vmul.f32 %v3304_v19, %v3223_v36  ;;  %v3328_v35 = vpop.permute.xlu0 %1275 }
 0x2e6   : > { %1423 = vrot.lane.b32.xlu0 %v1415_v4, %s3644_s19  ;;  %1301 = vrot.lane.b32.xlu1 %v1293_v34, %s2778_s30  ;;  %v3326_v34 = vpop.permute.xlu1 %1280 }
 0x2e7   : > { %v1059_v38 = vpop.f32.mrb[4].mxu0  ;;  %v3229_v39 = vpop.f32.mrb[8].mxu1 }
 0x2e8   : > { %v907_v42 = vpop.f32.mrb[9].mxu1  ;;  %v3233_v43 = vpop.f32.mrb[5].mxu0  ;;  %v1295_v46 = vmul.f32 %v3202_v25, %v3229_v39  ;;  %v1417_v51 = vmul.f32 %v3244_v48, %v1059_v38  ;;  %v1388_v53 = vmul.f32 %v3212_v30, %v1059_v38 }
 0x2e9   : > { %v1325_v54 = vmul.f32 %v3214_v31, %v907_v42  ;;  %v1296_v55 = vmul.f32 %v3202_v25, %v907_v42  ;;  %v1418_v58 = vmul.f32 %v3244_v48, %v3233_v43  ;;  %v1446_v18 = vmul.f32 %v3318_v24, %v3233_v43  ;;  %v3332_v38 = vpop.permute.xlu0 %1370 }
 0x2ea   : > { %1395 = vrot.lane.b32.xlu1 %v1386_v40, %s2778_s30  ;;  %1331 = vrot.lane.b32.xlu0 %v1323_v41, %s3644_s19  ;;  %v3330_v36 = vpop.permute.xlu1 %1366 }
 0x2eb   : > { %v976_v44 = vpop.f32.mrb[10].mxu1 }
 0x2ec   : > { %v3240_v47 = vpop.f32.mrb[11].mxu1  ;;  %v1353_v56 = vmul.f32 %v3206_v26, %v976_v44  ;;  %v1324_v62 = vmul.f32 %v3204_v3, %v976_v44 }
 0x2ed   : > { %v1385_v59 = vmul.f32 %v3225_v37, %v3240_v47 }
 0x2ee   : > { %1303 = vrot.lane.b32.xlu1 %v1294_v45, %s2778_s30  ;;  %1305 = vrot.lane.b32.xlu0 %v1295_v46, %s2778_s30 }
 0x2ef   : > { %v982_v49 = vpop.f32.mrb[12].mxu1 }
 0x2f0   : > { %v3249_v52 = vpop.f32.mrb[13].mxu1  ;;  %v1326_v5 = vmul.f32 %v3214_v31, %v982_v49  ;;  %v1354_v14 = vmul.f32 %v3208_v27, %v982_v49 }
 0x2f1   : > { %v1387_v63 = vmul.f32 %v3212_v30, %v3249_v52 }
 0x2f2   : > { %1425 = vrot.lane.b32.xlu1 %v1416_v50, %s3644_s19  ;;  %1427 = vrot.lane.b32.xlu0 %v1417_v51, %s3644_s19 }
 0x2f6   : > { %1399 = vrot.lane.b32.xlu1 %v1388_v53, %s2778_s30  ;;  %1335 = vrot.lane.b32.xlu0 %v1325_v54, %s3644_s19 }
 0x2fa   : > { %1307 = vrot.lane.b32.xlu1 %v1296_v55, %s2778_s30  ;;  %1357 = vrot.lane.b32.xlu0 %v1353_v56, %s3642_s16 }
 0x2fb   : > { %v3261_v57 = vpop.f32.mrb[6].mxu0 }
 0x2fc   : > { %v3267_v60 = vpop.f32.mrb[7].mxu0  ;;  %v1491_v8 = vmul.f32 %v3225_v37, %v3261_v57 }
 0x2fd   : > { %v1507_v22 = vmul.f32 %v3304_v19, %v3267_v60 }
 0x2fe   : > { %1429 = vrot.lane.b32.xlu1 %v1418_v58, %s3644_s19  ;;  %1393 = vrot.lane.b32.xlu0 %v1385_v59, %s2778_s30  ;;  %v1283_v59 = vmul.f32 %v3328_v35, %v3218_v33 }
 0x2ff   : > { %v3271_v61 = vpop.f32.mrb[8].mxu0 }
 0x300   : > { %v3276_v0 = vpop.f32.mrb[9].mxu0  ;;  %v1492_v16 = vmul.f32 %v3212_v30, %v3271_v61 }
 0x301   : > { %v1508_v4 = vmul.f32 %v3318_v24, %v3276_v0 }
 0x302   : > { %1333 = vrot.lane.b32.xlu1 %v1324_v62, %s3644_s19  ;;  %1397 = vrot.lane.b32.xlu0 %v1387_v63, %s2778_s30 }
 0x303   : > { %v3280_v1 = vpop.f32.mrb[14].mxu1 }
 0x304   : > { %v3285_v12 = vpop.f32.mrb[15].mxu1  ;;  %v1459_v2 = vmul.f32 %v3210_v29, %v3280_v1 }
 0x305   : > { %v1475_v17 = vmul.f32 %v3206_v26, %v3285_v12 }
 0x306   : > { %1337 = vrot.lane.b32.xlu1 %v1326_v5, %s3644_s19  ;;  %1495 = vrot.lane.b32.xlu0 %v1491_v8, %s3644_s19 }
 0x307   : > { %v3289_v13 = vpop.f32.mrb[16].mxu1 }
 0x308   : > { %v3294_v15 = vpop.f32.mrb[17].mxu1  ;;  %v1460_v21 = vmul.f32 %v3202_v25, %v3289_v13 }
 0x309   : > { %v1476_v23 = vmul.f32 %v3208_v27, %v3294_v15 }
 0x30a   : > { %1359 = vrot.lane.b32.xlu1 %v1354_v14, %s3642_s16  ;;  %1463 = vrot.lane.b32.xlu0 %v1459_v2, %s3644_s19  ;;  %v1284_v2 = vmul.f32 %v3326_v34, %v3229_v39  ;;  %v1374_v39 = vmul.f32 %v3332_v38, %v3249_v52 }
 0x30e   : > { %1497 = vrot.lane.b32.xlu1 %v1492_v16, %s3644_s19  ;;  %1479 = vrot.lane.b32.xlu0 %v1475_v17, %s3644_s19  ;;  %v1373_v17 = vmul.f32 %v3330_v36, %v3240_v47 }
 0x312   : > { %1449 = vrot.lane.b32.xlu0 %v1445_v20, %s3642_s16  ;;  %1465 = vrot.lane.b32.xlu1 %v1460_v21, %s3644_s19 }
 0x316   : > { %1511 = vrot.lane.b32.xlu0 %v1507_v22, %s3644_s19  ;;  %1481 = vrot.lane.b32.xlu1 %v1476_v23, %s3644_s19 }
 0x31a   : > { %1451 = vrot.lane.b32.xlu1 %v1446_v18, %s3642_s16 }
 0x31e   : > { %1513 = vrot.lane.b32.xlu1 %v1508_v4, %s3644_s19 }
 0x358   : > { %v1424_v40 = vpop.permute.xlu0 %1423  ;;  %v1302_v41 = vpop.permute.xlu1 %1301 }
 0x35c   : > { %v1396_v42 = vpop.permute.xlu1 %1395  ;;  %v1332_v44 = vpop.permute.xlu0 %1331 }
 0x360   : > { %v1304_v43 = vpop.permute.xlu1 %1303  ;;  %v1306_v45 = vpop.permute.xlu0 %1305 }
 0x361   : > { %v1309_v58 = vsel %vm789_vm8, %v1302_v41, %v1304_v43  ;;  %v1457_v41 = vmul.f32 %v3328_v35, %v3280_v1 }
 0x362   : > { %v1313_v62 = vadd.f32 %v1309_v58, %v1283_v59 }
 0x364   : > { %v1426_v46 = vpop.permute.xlu1 %1425  ;;  %v3334_v49 = vpop.permute.xlu0 %1427 }
 0x368   : > { %v1400_v50 = vpop.permute.xlu1 %1399  ;;  %v1336_v51 = vpop.permute.xlu0 %1335 }
 0x36c   : > { %v1308_v53 = vpop.permute.xlu1 %1307  ;;  %v1358_v54 = vpop.permute.xlu0 %1357 }
 0x36d   : > { %v1310_v8 = vsel %vm789_vm8, %v1306_v45, %v1308_v53  ;;  %v1471_v45 = vmul.f32 %v3204_v3, %v3285_v12  ;;  %v1503_v12 = vmul.f32 %v3216_v32, %v3267_v60 }
 0x36e   : > { %v1314_v20 = vadd.f32 %v1310_v8, %v1284_v2  ;;  %v1458_v8 = vmul.f32 %v3326_v34, %v3289_v13  ;;  %v1488_v13 = vmul.f32 %v3332_v38, %v3271_v61 }
 0x370   : > { %v1430_v55 = vpop.permute.xlu1 %1429  ;;  %v1394_v56 = vpop.permute.xlu0 %1393 }
 0x371   : > { %v1401_v1 = vsel %vm789_vm8, %v1394_v56, %v1396_v42 }
 0x374   : > { %v1334_v63 = vpop.permute.xlu1 %1333  ;;  %v1398_v5 = vpop.permute.xlu0 %1397 }
 0x375   : > { %v1339_v14 = vsel %vm792_vm9, %v1332_v44, %v1334_v63  ;;  %v1402_v60 = vsel %vm789_vm8, %v1398_v5, %v1400_v50 }
 0x376   : > { %v1343_v16 = vadd.f32 %v1339_v14, %v1313_v62 }
 0x378   : > { %v1363_v21 = vadd.f32 %v1358_v54, %v1343_v16  ;;  %v1338_v22 = vpop.permute.xlu1 %1337  ;;  %v1496_v23 = vpop.permute.xlu0 %1495 }
 0x379   : > { %v1340_v33 = vsel %vm792_vm9, %v1336_v51, %v1338_v22  ;;  %v1487_v51 = vmul.f32 %v3330_v36, %v3261_v57  ;;  %v1431_v57 = vsel %vm792_vm9, %v1424_v40, %v1426_v46 }
 0x37a   : > { %v1344_v18 = vadd.f32 %v1340_v33, %v1314_v20  ;;  %v1375_v4 = vadd.f32 %v1373_v17, %v1363_v21  ;;  %v1472_v17 = vmul.f32 %v3214_v31, %v3294_v15  ;;  %v3370_v15 = vld [vmem:[%s3680_s24] sm:$0xff] }
 0x37c   : > { %v1360_v43 = vpop.permute.xlu1 %1359  ;;  %v1464_v44 = vpop.permute.xlu0 %1463  ;;  %v1405_v52 = vadd.f32 %v1401_v1, %v1375_v4 }
 0x37d   : > { %v1364_v47 = vadd.f32 %v1360_v43, %v1344_v18  ;;  %v1469_v53 = vadd.f32 %v1464_v44, %v1457_v41 }
 0x37e   : > { %v1435_v22 = vadd.f32 %v1431_v57, %v1405_v52 }
 0x37f   : > { %v1376_v54 = vadd.f32 %v1374_v39, %v1364_v47  ;;  %v1473_v58 = vadd.f32 %v1471_v45, %v1469_v53  ;;  %v1504_v39 = vmul.f32 %v3244_v48, %v3276_v0  ;;  %v1432_v47 = vsel %vm792_vm9, %v3334_v49, %v1430_v55 }
 0x380   : > { %v1498_v59 = vpop.permute.xlu1 %1497  ;;  %v1480_v62 = vpop.permute.xlu0 %1479 }
 0x381   : > { %v1485_v63 = vadd.f32 %v1480_v62, %v1473_v58 }
 0x383   : > { %v1489_v14 = vadd.f32 %v1487_v51, %v1485_v63 }
 0x384   : > { %v1450_v2 = vpop.permute.xlu0 %1449  ;;  %v1466_v16 = vpop.permute.xlu1 %1465 }
 0x385   : > { %v1470_v20 = vadd.f32 %v1466_v16, %v1458_v8  ;;  %v1501_v21 = vadd.f32 %v1496_v23, %v1489_v14  ;;  %v3364_v4 = vadd.f32 %v1450_v2, %v1435_v22  ;;  %v1406_v23 = vadd.f32 %v1402_v60, %v1376_v54  ;;  %v3383_v54 = vld [vmem:[%s3680_s24 + $0x8] sm:$0xff]  ;;  %v1711_v22 = vld [vmem:[%s3682_s26 + $0x20] sm:$0xff] }
 0x386   : > { %v1720_v60 = vld [vmem:[%s3682_s26 + $0x68] sm:$0xff] }
 0x387   : > { %v1505_v33 = vadd.f32 %v1503_v12, %v1501_v21  ;;  %v1474_v42 = vadd.f32 %v1472_v17, %v1470_v20  ;;  %v1436_v5 = vadd.f32 %v1432_v47, %v1406_v23  ;;  %v1707_v17 = vld [vmem:[%s3682_s26] sm:$0xff]  ;;  %v1714_v20 = vld [vmem:[%s3682_s26 + $0x38] sm:$0xff] }
 0x388   : > { %v1512_v56 = vpop.permute.xlu0 %1511  ;;  %v1482_v18 = vpop.permute.xlu1 %1481 }
 0x389   : > { %v1517_v41 = vadd.f32 %v1512_v56, %v1505_v33  ;;  %v1486_v43 = vadd.f32 %v1482_v18, %v1474_v42  ;;  %v1713_v33 = vld [vmem:[%s3682_s26 + $0x30] sm:$0xff]  ;;  %v1716_v42 = vld [vmem:[%s3682_s26 + $0x48] sm:$0xff]  ;;  %v1718_v56 = vld [vmem:[%s3682_s26 + $0x58] sm:$0xff] }
 0x38a   : > { %v2316_v18 = vpack.c.bf16 %v1713_v33, %v1711_v22 }
 0x38b   : > { %v1519_v40 = vadd.f32 %v1517_v41, %v3364_v4  ;;  %v1490_v46 = vadd.f32 %v1488_v13, %v1486_v43  ;;  %v2318_v13 = vpack.c.bf16 %v1718_v56, %v1716_v42  ;;  %v1715_v41 = vld [vmem:[%s3682_s26 + $0x40] sm:$0xff]  ;;  %v1717_v43 = vld [vmem:[%s3682_s26 + $0x50] sm:$0xff] }
 0x38c   : > { %v1452_v44 = vpop.permute.xlu1 %1451 }
 0x38d   : > { %v1521_v61 = vadd.f32 %v1519_v40, %v3370_v15  ;;  %v1502_v45 = vadd.f32 %v1498_v59, %v1490_v46  ;;  %v3378_v62 = vadd.f32 %v1452_v44, %v1436_v5  ;;  %v1722_v40 = vld [vmem:[%s3682_s26 + $0x78] sm:$0xff]  ;;  %v2320_v46 = vpack.c.bf16 %v1717_v43, %v1715_v41  ;;  %v1719_v44 = vld [vmem:[%s3682_s26 + $0x60] sm:$0xff] }
 0x38e   : > { %v2322_v23 = vpack.c.bf16 %v1722_v40, %v1720_v60  ;;  %v1723_v5 = vld [vmem:[%s3682_s26 + $0x80] sm:$0xff] }
 0x38f   : > { %v2139_v50 = vmul.f32 -1.442695, %v1521_v61  ;;  %v1506_v53 = vadd.f32 %v1504_v39, %v1502_v45  ;;  %v1721_v39 = vld [vmem:[%s3682_s26 + $0x70] sm:$0xff]  ;;  %v1724_v61 = vld [vmem:[%s3682_s26 + $0x88] sm:$0xff]  ;;  %v1726_v45 = vld [vmem:[%s3682_s26 + $0x98] sm:$0xff] }
 0x390   : > { %v1514_v58 = vpop.permute.xlu1 %1513  ;;  %v2324_v47 = vpack.c.bf16 %v1721_v39, %v1719_v44 }
 0x391   : > { %v1518_v51 = vadd.f32 %v1514_v58, %v1506_v53  ;;  %2504 = vpow2.f32 %v2139_v50  ;;  %v2326_v50 = vpack.c.bf16 %v1726_v45, %v1724_v61  ;;  %v1725_v53 = vld [vmem:[%s3682_s26 + $0x90] sm:$0xff] }
 0x392   : > { %v2328_v58 = vpack.c.bf16 %v1725_v53, %v1723_v5 }
 0x393   : > { %v1520_v0 = vadd.f32 %v1518_v51, %v3378_v62  ;;  %v1728_v51 = vld [vmem:[%s3682_s26 + $0xa8] sm:$0xff] }
 0x395   : > { %v1522_v59 = vadd.f32 %v1520_v0, %v3383_v54  ;;  %v1730_v0 = vld [vmem:[%s3682_s26 + $0xb8] sm:$0xff] }
 0x397   : > { %v2140_v63 = vmul.f32 -1.442695, %v1522_v59  ;;  %v2330_v59 = vpack.c.bf16 %v1730_v0, %v1728_v51 }
 0x399   : > { %2506 = vpow2.f32 %v2140_v63  ;;  %v1727_v63 = vld [vmem:[%s3682_s26 + $0xa0] sm:$0xff] }
 0x39b   : > { %v2505_v49 = vpop.eup %2504 }
 0x39c   : > { %v1529_v55 = vadd.f32 1.0, %v2505_v49  ;;  %v1729_v49 = vld [vmem:[%s3682_s26 + $0xb0] sm:$0xff] }
 0x39e   : > { %2508 = vrcp.f32 %v1529_v55  ;;  %v2332_v55 = vpack.c.bf16 %v1729_v49, %v1727_v63 }
 0x3a3   : > { %v2507_v1 = vpop.eup %2506 }
 0x3a4   : > { %v1530_v8 = vadd.f32 1.0, %v2507_v1 }
 0x3a6   : > { %2510 = vrcp.f32 %v1530_v8 }
 0x3a8   : > { %v3387_v14 = vpop.eup %2508 }
 0x3a9   : > { %v3393_v2 = vmul.f32 %v3387_v14, %v3115_v6  ;;  %v1708_v6 = vld [vmem:[%s3681_s27 + $0x8] sm:$0xff]  ;;  %s3684_s27 = smov 96  }
 0x3b0   : > { %v3389_v52 = vpop.eup %2510 }
 0x3b1   : > { %v3397_v16 = vmul.f32 %v3389_v52, %v3117_v7  ;;  %v1710_v7 = vld [vmem:[%s3682_s26 + $0x18] sm:$0xff] }
 0x3b3   : > { %v2302_v12 = vpack.c.bf16 %v3397_v16, %v3393_v2 }
 0x3b5   : > { %2303 = vmatprep.subr.bf16.mxu1 %v2302_v12 }
 0x3b6   : > { %2305 = vmatpush3.bf16.msra.mxu1 %v2302_v12 }
 0x3b7   : > { %2307 = vmatprep.subr.bf16.mxu1 %v2302_v12 }
 0x3b9   : > { %2211 = vmatmul.mubr.msk.f32.vlgmr.msra.gmra.mrb[18].mxu1 %vm435_vm1, %v3121_v9  ;;  %v2310_v9 = vpack.c.bf16 %v1710_v7, %v1708_v6 }
 0x3ba   : > { %2309 = vmatpush3.bf16.msra.mxu1 %v2302_v12  ;;  %2217 = vmatprep.mubr.msk.f32.mxu1 %vm435_vm1, %v3123_v10  ;;  %v1709_v10 = vld [vmem:[%s3682_s26 + $0x10] sm:$0xff] }
 0x3bb   : > { %v2312_v21 = vpack.c.bf16 %v1709_v10, %v1707_v17  ;;  %2311 = vmatprep.subr.bf16.mxu0 %v2310_v9 }
 0x3bd   : > { %2218 = vmatmul.mubr.msk.f32.vlgmr.msra.gmra.mrb[20].mxu1 %vm435_vm1, %v3129_v11  ;;  %v1712_v11 = vld [vmem:[%s3682_s26 + $0x28] sm:$0xff]  ;;  %2313 = vmatpush1.bf16.msra.mxu0 %v2312_v21 }
 0x3be   : > { %v2314_v57 = vpack.c.bf16 %v1714_v20, %v1712_v11 }
 0x3c0   : > { %2315 = vmatprep.subr.bf16.mxu0 %v2314_v57 }
 0x3c1   : > { %2317 = vmatpush1.bf16.msra.mxu0 %v2316_v18 }
 0x3c2   : > { %2319 = vmatprep.subr.bf16.mxu0 %v2318_v13 }
 0x3c5   : > { %2321 = vmatpush1.bf16.msra.mxu0 %v2320_v46 }
 0x3c6   : > { %2323 = vmatprep.subr.bf16.mxu0 %v2322_v23 }
 0x3c9   : > { %2325 = vmatpush1.bf16.msra.mxu0 %v2324_v47 }
 0x3ca   : > { %2327 = vmatprep.subr.bf16.mxu0 %v2326_v50 }
 0x3cd   : > { %2329 = vmatpush1.bf16.msra.mxu0 %v2328_v58 }
 0x3ce   : > { %2331 = vmatprep.subr.bf16.mxu0 %v2330_v59 }
 0x3d1   : > { %2333 = vmatpush1.bf16.msra.mxu0 %v2332_v55 }
 0x48c   : > { %v2212_v1 = vpop.f32.mrb[18].mxu1 }
 0x48d   : > { %v1603_v8 = vpop.f32.mrb[19].mxu1 }
 0x48e   : > { %1689 = vrot.lane.b32.xlu0 %v1603_v8, %s2778_s30  ;;  %v2516_v8 = vld [vmem:[#allocation2] sm:$0xff] }
 0x490   : > { %v2219_v12 = vpop.f32.mrb[20].mxu1 }
 0x491   : > { %v1678_v6 = vpop.f32.mrb[21].mxu1 }
 0x492   : > { %1691 = vrot.lane.b32.xlu0 %v2212_v1, %s2778_s30  ;;  %1697 = vrot.lane.b32.xlu1 %v1678_v6, %s3683_s23 }
 0x496   : > { %1699 = vrot.lane.b32.xlu1 %v2219_v12, %s3683_s23 }
 0x500   : > { %v1690_v7 = vpop.permute.xlu0 %1689 }
 0x501   : > { %v1703_v17 = vsel %vm789_vm8, %v3393_v2, %v1690_v7 }
 0x504   : > { %v1698_v9 = vpop.permute.xlu1 %1697  ;;  %v1692_v10 = vpop.permute.xlu0 %1691 }
 0x505   : > { %v1705_v11 = vsel %vm792_vm9, %v1703_v17, %v1698_v9  ;;  %v1704_v20 = vsel %vm789_vm8, %v3397_v16, %v1692_v10 }
 0x506   : > { %2145 = vmatmul.mubr.msk.f32.vlgmr.msra.gmra.mrb[10].mxu0 %vm1112_vm10, %v1705_v11 }
 0x507   : > { %1807 = vmatprep.mubr.f32.mxu0 %v2775_v28 }
 0x508   : > { %v1700_v21 = vpop.permute.xlu1 %1699 }
 0x509   : > { %v1706_v57 = vsel %vm792_vm9, %v1704_v20, %v1700_v21 }
 0x50a   : > { %2146 = vmatmul.mubr.msk.f32.gmra.mrb[12].mxu0 %vm1112_vm10, %v1706_v57 }
 0x5d9   : > { %v1803_v22 = vpop.f32.mrb[10].mxu0 }
 0x5da   : > { %v1805_v33 = vpop.f32.mrb[11].mxu0  ;;  %v1816_v2 = vmul.f32 %v1803_v22, %v3210_v29  ;;  %v1828_v18 = vmul.f32 %v1803_v22, %v3204_v3  ;;  %v1840_v16 = vmul.f32 %v1803_v22, %v3206_v26 }
 0x5db   : > { %v1856_v29 = vmul.f32 %v1805_v33, %v3225_v37  ;;  %v1868_v3 = vmul.f32 %v1805_v33, %v3216_v32  ;;  %v1852_v39 = vmul.f32 %v1805_v33, %v3330_v36 }
 0x5dc   : > { %1820 = vrot.lane.b32.xlu0 %v1816_v2, %s3684_s27 }
 0x5dd   : > { %v1809_v42 = vpop.f32.mrb[12].mxu0 }
 0x5de   : > { %v1811_v56 = vpop.f32.mrb[13].mxu0  ;;  %v1817_v28 = vmul.f32 %v1809_v42, %v3202_v25  ;;  %v1829_v13 = vmul.f32 %v1809_v42, %v3214_v31  ;;  %v1841_v41 = vmul.f32 %v1809_v42, %v3208_v27  ;;  %v1880_v31 = vmul.f32 %v1805_v33, %v3304_v19 }
 0x5df   : > { %v1857_v25 = vmul.f32 %v1811_v56, %v3212_v30  ;;  %v1869_v26 = vmul.f32 %v1811_v56, %v3244_v48  ;;  %v1881_v27 = vmul.f32 %v1811_v56, %v3318_v24  ;;  %v1814_v30 = vmul.f32 %v1803_v22, %v3328_v35 }
 0x5e0   : > { %1832 = vrot.lane.b32.xlu0 %v1828_v18, %s3683_s23  ;;  %1822 = vrot.lane.b32.xlu1 %v1817_v28, %s3684_s27  ;;  %v1815_v46 = vmul.f32 %v1809_v42, %v3326_v34  ;;  %v1853_v50 = vmul.f32 %v1811_v56, %v3332_v38  ;;  %v2517_v38 = vld [vmem:[#allocation2 + $0x8] sm:$0xff]  ;;  %v1917_v33 = vsub.f32 1.0, %v3389_v52 }
 0x5e4   : > { %1844 = vrot.lane.b32.xlu0 %v1840_v16, %s2778_s30  ;;  %1834 = vrot.lane.b32.xlu1 %v1829_v13, %s3683_s23 }
 0x5e8   : > { %1860 = vrot.lane.b32.xlu0 %v1856_v29, %s3684_s27  ;;  %1846 = vrot.lane.b32.xlu1 %v1841_v41, %s2778_s30 }
 0x5ec   : > { %1872 = vrot.lane.b32.xlu0 %v1868_v3, %s3683_s23  ;;  %1862 = vrot.lane.b32.xlu1 %v1857_v25, %s3684_s27 }
 0x5f0   : > { %1884 = vrot.lane.b32.xlu0 %v1880_v31, %s2778_s30  ;;  %1874 = vrot.lane.b32.xlu1 %v1869_v26, %s3683_s23 }
 0x5f4   : > { %1886 = vrot.lane.b32.xlu1 %v1881_v27, %s2778_s30 }
 0x64e   : > { %v1821_v37 = vpop.permute.xlu0 %1820 }
 0x64f   : > { %v1826_v60 = vadd.f32 %v1821_v37, %v1814_v30 }
 0x652   : > { %v1833_v32 = vpop.permute.xlu0 %1832  ;;  %v1823_v43 = vpop.permute.xlu1 %1822 }
 0x653   : > { %v1838_v40 = vadd.f32 %v1833_v32, %v1826_v60  ;;  %v1827_v19 = vadd.f32 %v1823_v43, %v1815_v46 }
 0x656   : > { %v1845_v48 = vpop.permute.xlu0 %1844  ;;  %v1835_v23 = vpop.permute.xlu1 %1834 }
 0x657   : > { %v1850_v44 = vadd.f32 %v1845_v48, %v1838_v40  ;;  %v1839_v61 = vadd.f32 %v1835_v23, %v1827_v19 }
 0x659   : > { %v1854_v45 = vadd.f32 %v1852_v39, %v1850_v44 }
 0x65a   : > { %v1861_v24 = vpop.permute.xlu0 %1860  ;;  %v1847_v47 = vpop.permute.xlu1 %1846 }
 0x65b   : > { %v1851_v5 = vadd.f32 %v1847_v47, %v1839_v61  ;;  %v1866_v51 = vadd.f32 %v1861_v24, %v1854_v45 }
 0x65d   : > { %v1855_v35 = vadd.f32 %v1853_v50, %v1851_v5 }
 0x65e   : > { %v1873_v53 = vpop.permute.xlu0 %1872  ;;  %v1863_v58 = vpop.permute.xlu1 %1862 }
 0x65f   : > { %v1878_v0 = vadd.f32 %v1873_v53, %v1866_v51  ;;  %v1867_v63 = vadd.f32 %v1863_v58, %v1855_v35 }
 0x662   : > { %v1885_v59 = vpop.permute.xlu0 %1884  ;;  %v1875_v34 = vpop.permute.xlu1 %1874 }
 0x663   : > { %v1890_v49 = vadd.f32 %v1885_v59, %v1878_v0  ;;  %v1879_v55 = vadd.f32 %v1875_v34, %v1867_v63 }
 0x665   : > { %1894 = vrot.lane.b32.xlu0 %v1890_v49, %s3683_s23 }
 0x666   : > { %v1887_v36 = vpop.permute.xlu1 %1886 }
 0x667   : > { %v1891_v1 = vadd.f32 %v1887_v36, %v1879_v55 }
 0x669   : > { %1908 = vrot.lane.b32.xlu0 %v2516_v8, %s2778_s30  ;;  %1896 = vrot.lane.b32.xlu1 %v1891_v1, %s3683_s23  ;;  %s2789_s23 = smov [#allocation11]  }
 0x66d   : > { %1910 = vrot.lane.b32.xlu1 %v2517_v38, %s2778_s30  ;;  %s2148_s30 = sshll.u32 %s2746_s11, 1  ;;  %s3687_s11 = sand.u32 1, %s2726_s28  }
 0x66e   : > { %s1955_s6 = sadd.s32 %s2149_s2, %s2148_s30  ;;  %s3554_s12 = scalar_lea.sflag [#allocation5], %s3687_s11 }
 0x66f   : > { %s2150_s18 = sshll.u32 %s1955_s6, 7 }
 0x670   : > { %s3545_s22 = scalar_lea.hbm %s3686_s17, %s2150_s18 }
 0x6d7   : > { %v1895_v12 = vpop.permute.xlu0 %1894 }
 0x6d8   : > { %v1900_v6 = vadd.f32 %v1895_v12, %v3364_v4  ;;  %v1916_v4 = vsub.f32 1.0, %v3387_v14 }
 0x6da   : > { %v1902_v7 = vadd.f32 %v1900_v6, %v3370_v15 }
 0x6db   : > { %v1897_v17 = vpop.permute.xlu1 %1896  ;;  %v1909_v21 = vpop.permute.xlu0 %1908 }
 0x6dc   : > { %2512 = vtanh.f32 %v1902_v7  ;;  %v1901_v9 = vadd.f32 %v1897_v17, %v3378_v62  ;;  %v1914_v22 = vmul.f32 %v3387_v14, %v1909_v21 }
 0x6de   : > { %v1903_v10 = vadd.f32 %v1901_v9, %v3383_v54 }
 0x6df   : > { %v1911_v57 = vpop.permute.xlu1 %1910 }
 0x6e0   : > { %2514 = vtanh.f32 %v1903_v10  ;;  %v1915_v42 = vmul.f32 %v3389_v52, %v1911_v57 }
 0x6e6   : > { %v2513_v11 = vpop.eup %2512 }
 0x6e7   : > { %1920 = vrot.lane.b32.xlu0 %v2513_v11, %s3684_s27 }
 0x6ea   : > { %v2515_v20 = vpop.eup %2514 }
 0x6eb   : > { %1922 = vrot.lane.b32.xlu1 %v2515_v20, %s3684_s27 }
 0x759   : > { %v1921_v15 = vpop.permute.xlu0 %1920 }
 0x75a   : > { %v1926_v62 = vmul.f32 %v1921_v15, %v1916_v4 }
 0x75c   : > { %v1928_v54 = vadd.f32 %v1926_v62, %v1914_v22 }
 0x75d   : > { %v1923_v2 = vpop.permute.xlu1 %1922 }
 0x75e   : > { %v1927_v56 = vmul.f32 %v1923_v2, %v1917_v33  ;;  %1932 = vrot.lane.b32.xlu0 %v1928_v54, %s3684_s27 }
 0x760   : > { %v1929_v18 = vadd.f32 %v1927_v56, %v1915_v42 }
 0x762   : > { %1934 = vrot.lane.b32.xlu1 %v1929_v18, %s3684_s27  ;;  %s2636_s27 = sshll.u32 %s2789_s23, 4  ;;  %s2637_s27 = int_to_ptr.vmem [resolvable:$false] %s2636_s27 }
 0x763   : > { %s2638_s30 = scalar_lea.vmem %s2637_s27, 512  ;;  %p2639_p5 = scmp.lt.s32.totalorder %s3547_s5, %s2637_s27 }
 0x764   : > { %p2640_p8 = scmp.lt.s32.totalorder %s2638_s30, %s2632_s20 }
 0x766   : > { %p2641_p12 = por %p2640_p8, %p2639_p5 }
 0x768   : > { %p2642_p2 = pnand %p2641_p12, %p2635_p0 }
 0x7d0   : > { %v1933_v14 = vpop.permute.xlu0 %1932 }
 0x7d1   : > { %1938 = vst.msk [vmem:[#allocation2] sm:$0xff] %vm789_vm8, %v1933_v14  ;;  %1940 = vst.msk [vmem:[%s3100_s4] sm:$0xff] %vm789_vm8, %v1933_v14 }
 0x7d4   : > { %v1935_v52 = vpop.permute.xlu1 %1934 }
 0x7d5   : > { %1939 = vst.msk [vmem:[#allocation2 + $0x8] sm:$0xff] %vm789_vm8, %v1935_v52  ;;  %1941 = vst.msk [vmem:[%s3100_s4 + $0x8] sm:$0xff] %vm789_vm8, %v1935_v52 }
 0x7d6   : > { %2645 = shalt.err (!%p2642_p2)
}
 0x7d7   : > { %s2646_s4 = scalar_lea.hbm %s3545_s22, 256  ;;  %s2650_s18 = scalar_lea.hbm %s3686_s17, 2048 }
 0x7d8   : > { %p2647_p6 = scmp.ne.s32.totalorder %s3545_s22, %s2646_s4  ;;  %p2651_p4 = scmp.lt.u32.totalorder %s3545_s22, %s3686_s17 }
 0x7d9   : > { %p2652_p3 = scmp.lt.u32.totalorder %s2650_s18, %s2646_s4  ;;  %p2654_p9 = scmp.lt.u32.totalorder %s2646_s4, %s3545_s22 }
 0x7da   : > { %p2648_p10 = pnand %p2647_p6, %p3688_p13 }
 0x7db   : > { %p2653_p7 = por %p2652_p3, %p2651_p4 }
 0x7dc   : > { %p2649_p1 = pneg %p2648_p10 }
 0x7dd   : > { %p2655_p11 = por %p2654_p9, %p2653_p7 }
 0x7df   : > { %p2656_p0 = pnand %p2655_p11, %p2649_p1 }
 0x7e1   : > { %2659 = shalt.err (!%p2656_p0)
}
 0x7e2   : > { %s2790_s11 = smov 128   ;;  %s3689_s20 = smov 8  }
 0x7e3   : > { %2348 = dma.vmem_to_hbm [thread:$0]  (%p3688_p13), %s3547_s5, 256, %s3545_s22, %s3554_s12, %s2790_s11, %s2790_s11, %s3689_s20  }
 0x7e4 PF: > { %s3690_s23 = sld [smem:[#allocation16_spill]]  ;;  %s3691_s27 = sld [smem:[#allocation18_spill]] }
 0x7e5   : > { %p2375_p5 = scmp.ge.s32.totalorder %s2762_s15, 2 }
 0x7ea   : > { %s1973_s30 = sand.u32 1, %s3690_s23   ;;  %p3692_p8 = scmp.ne.s32.totalorder %s3691_s27, 0 }
 0x7eb   : > { %s1974_s4 = scalar_lea.sflag [#allocation5], %s1973_s30 }
 0x7ec   : > { %p2365_p12 = pnand %p2375_p5, %p3692_p8 }
 0x7ee   : > { %2717 = dma.done.wait (!%p2365_p12), %s1974_s4, 256  }
 0x7ef   : > { %2719 = vsyncadd (!%p2365_p12), %s1974_s4, 4294967040  ;;  %s26_s15 = sadd.s32 1, %s2762_s15   ;;  %s3693_s27 = smov %s2726_s28 }
 0x7f0   : > { %p23_p2 = scmp.ge.s32.totalorder %s26_s15, 10   ;;  %s3694_s28 = smov %s2730_s29 }
 0x7f1   : > { %s3695_s29 = smov %s3027_s8  ;;  %s3696_s30 = smov %s2738_s9 }
 0x7f2   : > { %s3697_s9 = smov %s2742_s10  ;;  %s3698_s10 = smov %s3022_s25 }
 0x7f3   : > { %s3699_s11 = smov %s2754_s13  ;;  %s3700_s12 = smov %s2758_s14 }
 0x7f4   : > { %s3701_s13 = smov %s3704_s7  ;;  %s3702_s14 = smov %s3708_s0 }
 0x7f5   :  { %25 = sbr.rel (!%p23_p2) target bundleno = 20 (0x14), region = 117 }
 0x7fc   :  { %1979 = vsyncpa [#allocation4], 1 }
 0x7fd   :  { %1981 = vsyncpa [#allocation4 + $0x1], 1 }
 0x7fe   :  { %1982 = vsyncpa [#allocation7], 1 }
 0x7ff   :  { %1983 = vsyncpa [#allocation10], 1 }
 0x800   :  { %1984 = vsyncpa [#allocation5], 1 }
 0x801   :  { %1986 = vsyncpa [#allocation5 + $0x1], 1 }

</bundles_post_ra>
